<compile_context>
chip_gen: v6e
topology: v6e:2x2x1
jax: 0.10.0
libtpu: 0.0.40
codegen_flags: <defaults>
</compile_context>

<pallas_src>
import jax
import jax.numpy as jnp
from jax.experimental import pallas as pl
from jax.experimental.pallas import tpu as pltpu


# ----------------------------------------------------------------------------
# Single fused kernel: multi-layer GRU recurrence + MLP head.
# ----------------------------------------------------------------------------
def make_gru_mlp_kernel(num_layers, hidden_size, seq_len, batch, out_dim):
    H, T, B = hidden_size, seq_len, batch
    N = T * B
    inv_n = 1.0 / float(N)

    def kernel(lens_ref, x_ref, *rest):
        w_refs = rest[: 4 * num_layers]
        (w1_ref, b1_ref, g_ref, beta_ref, w2_ref, b2_ref) = rest[
            4 * num_layers: 4 * num_layers + 6]
        emb_ref, hid_ref, out_buf = rest[4 * num_layers + 6:]

        lens = lens_ref[...]                                      # (B, 1) int32

        # Loop-invariant weight/bias loads (tiny at these shapes -> hoist).
        wihs = [w_refs[4 * l + 0][...] for l in range(num_layers)]  # bf16 (in,3H)
        whhs = [w_refs[4 * l + 1][...] for l in range(num_layers)]  # bf16 (H,3H)
        bgis = [w_refs[4 * l + 2][...] for l in range(num_layers)]  # f32 (1,3H)
        bhns = [w_refs[4 * l + 3][...] for l in range(num_layers)]  # f32 (1,H)

        # ---- hoisted layer-0 input projection: one (T*B,E)x(E,3H) matmul ----
        x_all = x_ref[...]                                        # (T*B, E) bf16
        gi0_all = jnp.dot(x_all, wihs[0],
                          preferred_element_type=jnp.float32) + bgis[0]

        hs = [jnp.zeros((B, H), jnp.float32) for _ in range(num_layers)]

        # ---- pass 1: GRU recurrence, strictly serial per-step ops only ------
        # TODO(synk): at larger T/H switch the static unroll to
        # lax.fori_loop(unroll=k), block the time axis with an "arbitrary"
        # grid axis carrying h in VMEM scratch, and add a "parallel" batch
        # axis so v7x can shard across its two TensorCores (set
        # vmem_limit_bytes when the full-T buffers stop fitting 64 MiB).
        for t in range(T):
            # Hoisted per-step mask (reused by all layers + the output store).
            m = jnp.broadcast_to((lens > t).astype(jnp.float32), (B, H))
            inp = None
            for l in range(num_layers):
                h_prev = hs[l]
                if l == 0:
                    gi = gi0_all[t * B:(t + 1) * B, :]            # precomputed
                else:
                    gi = jnp.dot(inp.astype(jnp.bfloat16), wihs[l],
                                 preferred_element_type=jnp.float32) + bgis[l]
                gh = jnp.dot(h_prev.astype(jnp.bfloat16), whhs[l],
                             preferred_element_type=jnp.float32)
                rz = jax.nn.sigmoid(gi[:, :2 * H] + gh[:, :2 * H])  # r | z only
                r = rz[:, :H]
                z = rz[:, H:]
                n = jnp.tanh(gi[:, 2 * H:] + r * (gh[:, 2 * H:] + bhns[l]))
                # masked update: m=1 -> (1-z)*n + z*h_prev ; m=0 -> freeze
                h_new = h_prev + m * ((1.0 - z) * (n - h_prev))
                hs[l] = h_new
                inp = h_new

            # pad_packed zero padding; stash for the batched head matmuls.
            out_buf[pl.ds(t * B, B), :] = m * hs[-1]

        # Last layer's hidden, frozen at each sequence's last valid timestep
        # == nn.GRU's h_n[-1] (the only layer the module keeps).
        hid_ref[...] = hs[-1].astype(hid_ref.dtype)

        # ---- MLP head: batched over all T*B rows, outside the recurrence ----
        y = out_buf[...]                                          # (T*B, H) f32
        h1 = jnp.dot(y, w1_ref[...],
                     preferred_element_type=jnp.float32) + b1_ref[...]

        # BatchNorm1d training-mode batch stats over all T*B positions
        # (padded rows included, matching BN applied after pad_packed).
        # Two-pass mean/var for numerical safety.
        mean = jnp.sum(h1, axis=0, keepdims=True) * inv_n
        d = h1 - mean
        var = jnp.sum(d * d, axis=0, keepdims=True) * inv_n
        scale = jax.lax.rsqrt(var + 1e-5) * g_ref[...]
        a = jnp.maximum(d * scale + beta_ref[...], 0.0)           # BN + ReLU

        emb_ref[...] = (jnp.dot(a, w2_ref[...],
                                preferred_element_type=jnp.float32)
                        + b2_ref[...]).astype(emb_ref.dtype)

    return kernel


# ----------------------------------------------------------------------------
# GruLayer equivalent (use_bidir=False).
# TODO(synk): use_bidir=True (reverse-direction GRU pass) not implemented.
# ----------------------------------------------------------------------------
def gru_layer_forward(data_dict, gru_params, mlp_params, hidden_size, out_dim):
    word_embs = data_dict["lang_feat"]                            # [B, T, E] f32
    lang_len = data_dict["lang_len"]                              # [B] int
    B, T, E = word_embs.shape
    H = hidden_size
    L = len(gru_params)

    # Wrapper-side layout plumbing: time-major flat (T*B, E), bf16, so the
    # layer-0 projection is a single well-shaped MXU matmul in the kernel.
    x_flat = (jnp.transpose(word_embs, (1, 0, 2))
              .reshape(T * B, E).astype(jnp.bfloat16))
    lens = lang_len.astype(jnp.int32)[:, None]                    # [B, 1]

    args = [lens, x_flat]
    for p in gru_params:
        args += list(p)                                           # wih, whh, b_gi, b_hn
    args += list(mlp_params)                                      # w1, b1, gamma, beta, w2, b2

    emb_flat, hidden = pl.pallas_call(
        make_gru_mlp_kernel(L, H, T, B, out_dim),
        out_shape=[
            jax.ShapeDtypeStruct((T * B, out_dim), jnp.float32),
            jax.ShapeDtypeStruct((B, H), jnp.float32),
        ],
        scratch_shapes=[pltpu.VMEM((T * B, H), jnp.float32)],     # masked GRU out
    )(*args)

    lang_emb = jnp.transpose(emb_flat.reshape(T, B, out_dim), (1, 0, 2))
    out = dict(data_dict)
    out["lang_emb"] = lang_emb                                    # [B, T, out_dim]
    out["lang_hidden"] = hidden                                   # [B, H] (num_bidir=1)
    return out


def init_params(key, emb_size, hidden_size, num_layers, out_dim):
    H = hidden_size
    keys = jax.random.split(key, 4 * num_layers + 4)
    k_gru = H ** -0.5
    gru_params = []
    idx = 0
    for l in range(num_layers):
        in_size = emb_size if l == 0 else H
        wih = jax.random.uniform(keys[idx], (in_size, 3 * H),
                                 jnp.float32, -k_gru, k_gru); idx += 1
        whh = jax.random.uniform(keys[idx], (H, 3 * H),
                                 jnp.float32, -k_gru, k_gru); idx += 1
        bih = jax.random.uniform(keys[idx], (3, H),
                                 jnp.float32, -k_gru, k_gru); idx += 1
        bhh = jax.random.uniform(keys[idx], (3, H),
                                 jnp.float32, -k_gru, k_gru); idx += 1
        # Fold the r/z hidden-side biases into the input-side bias; the n-gate
        # hidden bias must stay inside the r*(...) term, so keep it separate.
        b_gi = jnp.concatenate([bih[0] + bhh[0],
                                bih[1] + bhh[1],
                                bih[2]])[None, :]                 # (1, 3H) f32
        b_hn = bhh[2][None, :]                                    # (1, H) f32
        gru_params.append((wih.astype(jnp.bfloat16),
                           whh.astype(jnp.bfloat16),
                           b_gi, b_hn))

    in_dim = H  # use_bidir=False
    k_c = in_dim ** -0.5
    w1 = jax.random.uniform(keys[idx], (in_dim, in_dim), jnp.float32, -k_c, k_c); idx += 1
    b1 = jax.random.uniform(keys[idx], (1, in_dim), jnp.float32, -k_c, k_c); idx += 1
    gamma = jnp.ones((1, in_dim), jnp.float32)
    beta = jnp.zeros((1, in_dim), jnp.float32)
    w2 = jax.random.uniform(keys[idx], (in_dim, out_dim), jnp.float32, -k_c, k_c); idx += 1
    b2 = jax.random.uniform(keys[idx], (1, out_dim), jnp.float32, -k_c, k_c); idx += 1
    return gru_params, (w1, b1, gamma, beta, w2, b2)


if __name__ == "__main__":
    # Small shapes consistent with the module: batch=2, seq=8, emb=64,
    # hidden=32, num_layers=2, out_dim=32, use_bidir=False.
    B, T, E, H, L, OUT = 2, 8, 64, 32, 2, 32

    key = jax.random.PRNGKey(0)
    k_param, k_feat = jax.random.split(key)
    gru_params, mlp_params = init_params(k_param, E, H, L, OUT)

    lang_feat = jax.random.normal(k_feat, (B, T, E), jnp.float32)
    lang_len = jnp.array([8, 5], dtype=jnp.int32)
    data_dict = {"lang_feat": lang_feat, "lang_len": lang_len}

    out = gru_layer_forward(data_dict, gru_params, mlp_params, H, OUT)
    lang_emb = jax.block_until_ready(out["lang_emb"])
    lang_hidden = jax.block_until_ready(out["lang_hidden"])

    assert lang_emb.shape == (B, T, OUT), lang_emb.shape
    assert lang_hidden.shape == (B, H), lang_hidden.shape
    assert bool(jnp.isfinite(lang_emb).all()) and bool(jnp.isfinite(lang_hidden).all())
    print("KERNEL_OK")
</pallas_src>

<mosaic_0001>
module attributes {stable_mosaic.version = 11 : i64} {
  func.func @kernel(%arg0: memref<2x1xi32, #tpu.memory_space<vmem>>, %arg1: memref<16x64xbf16, #tpu.memory_space<vmem>>, %arg2: memref<64x96xbf16, #tpu.memory_space<vmem>>, %arg3: memref<32x96xbf16, #tpu.memory_space<vmem>>, %arg4: memref<1x96xf32, #tpu.memory_space<vmem>>, %arg5: memref<1x32xf32, #tpu.memory_space<vmem>>, %arg6: memref<32x96xbf16, #tpu.memory_space<vmem>>, %arg7: memref<32x96xbf16, #tpu.memory_space<vmem>>, %arg8: memref<1x96xf32, #tpu.memory_space<vmem>>, %arg9: memref<1x32xf32, #tpu.memory_space<vmem>>, %arg10: memref<32x32xf32, #tpu.memory_space<vmem>>, %arg11: memref<1x32xf32, #tpu.memory_space<vmem>>, %arg12: memref<1x32xf32, #tpu.memory_space<vmem>>, %arg13: memref<1x32xf32, #tpu.memory_space<vmem>>, %arg14: memref<32x32xf32, #tpu.memory_space<vmem>>, %arg15: memref<1x32xf32, #tpu.memory_space<vmem>>, %arg16: memref<16x32xf32, #tpu.memory_space<vmem>>, %arg17: memref<2x32xf32, #tpu.memory_space<vmem>>, %arg18: memref<16x32xf32, #tpu.memory_space<vmem>>) attributes {dimension_semantics = [], scalar_prefetch = 0 : i64, scratch_operands = 1 : i64, tpu.core_type = #tpu.core_type<tc>} {
    %c0 = arith.constant 0 : index
    %c0_0 = arith.constant 0 : index
    %0 = vector.load %arg0[%c0, %c0_0] : memref<2x1xi32, #tpu.memory_space<vmem>>, vector<2x1xi32>
    %c0_1 = arith.constant 0 : index
    %c0_2 = arith.constant 0 : index
    %1 = vector.load %arg2[%c0_1, %c0_2] : memref<64x96xbf16, #tpu.memory_space<vmem>>, vector<64x96xbf16>
    %c0_3 = arith.constant 0 : index
    %c0_4 = arith.constant 0 : index
    %2 = vector.load %arg6[%c0_3, %c0_4] : memref<32x96xbf16, #tpu.memory_space<vmem>>, vector<32x96xbf16>
    %c0_5 = arith.constant 0 : index
    %c0_6 = arith.constant 0 : index
    %3 = vector.load %arg3[%c0_5, %c0_6] : memref<32x96xbf16, #tpu.memory_space<vmem>>, vector<32x96xbf16>
    %c0_7 = arith.constant 0 : index
    %c0_8 = arith.constant 0 : index
    %4 = vector.load %arg7[%c0_7, %c0_8] : memref<32x96xbf16, #tpu.memory_space<vmem>>, vector<32x96xbf16>
    %c0_9 = arith.constant 0 : index
    %c0_10 = arith.constant 0 : index
    %5 = vector.load %arg4[%c0_9, %c0_10] : memref<1x96xf32, #tpu.memory_space<vmem>>, vector<1x96xf32>
    %c0_11 = arith.constant 0 : index
    %c0_12 = arith.constant 0 : index
    %6 = vector.load %arg8[%c0_11, %c0_12] : memref<1x96xf32, #tpu.memory_space<vmem>>, vector<1x96xf32>
    %c0_13 = arith.constant 0 : index
    %c0_14 = arith.constant 0 : index
    %7 = vector.load %arg5[%c0_13, %c0_14] : memref<1x32xf32, #tpu.memory_space<vmem>>, vector<1x32xf32>
    %c0_15 = arith.constant 0 : index
    %c0_16 = arith.constant 0 : index
    %8 = vector.load %arg9[%c0_15, %c0_16] : memref<1x32xf32, #tpu.memory_space<vmem>>, vector<1x32xf32>
    %c0_17 = arith.constant 0 : index
    %c0_18 = arith.constant 0 : index
    %9 = vector.load %arg1[%c0_17, %c0_18] : memref<16x64xbf16, #tpu.memory_space<vmem>>, vector<16x64xbf16>
    %cst = arith.constant dense<0.000000e+00> : vector<16x96xf32>
    %10 = tpu.matmul %9, %1, %cst {dimension_numbers = #tpu.dot_dimension_numbers<[1], [0], [0], [1], [0, 0, 1, 1], [], []>} : vector<16x64xbf16>, vector<64x96xbf16>, vector<16x96xf32> -> vector<16x96xf32>
    %11 = vector.broadcast %5 : vector<1x96xf32> to vector<16x96xf32>
    %12 = arith.addf %10, %11 : vector<16x96xf32>
    %cst_19 = arith.constant 0.000000e+00 : f32
    %13 = vector.broadcast %cst_19 : f32 to vector<2x32xf32>
    %cst_20 = arith.constant 0.000000e+00 : f32
    %14 = vector.broadcast %cst_20 : f32 to vector<2x32xf32>
    %c0_i32 = arith.constant 0 : i32
    %15 = vector.broadcast %c0_i32 : i32 to vector<2x1xi32>
    %16 = arith.cmpi sgt, %0, %15 : vector<2x1xi32>
    %17 = arith.extui %16 : vector<2x1xi1> to vector<2x1xi32>
    %18 = arith.sitofp %17 : vector<2x1xi32> to vector<2x1xf32>
    %19 = vector.shape_cast %18 : vector<2x1xf32> to vector<2x1xf32>
    %20 = vector.broadcast %19 : vector<2x1xf32> to vector<2x32xf32>
    %21 = vector.extract_strided_slice %12 {offsets = [0, 0], sizes = [2, 96], strides = [1, 1]} : vector<16x96xf32> to vector<2x96xf32>
    %22 = arith.truncf %13 : vector<2x32xf32> to vector<2x32xbf16>
    %cst_21 = arith.constant dense<0.000000e+00> : vector<2x96xf32>
    %23 = tpu.matmul %22, %3, %cst_21 {dimension_numbers = #tpu.dot_dimension_numbers<[1], [0], [0], [1], [0, 0, 1, 1], [], []>} : vector<2x32xbf16>, vector<32x96xbf16>, vector<2x96xf32> -> vector<2x96xf32>
    %24 = vector.extract_strided_slice %21 {offsets = [0, 0], sizes = [2, 64], strides = [1, 1]} : vector<2x96xf32> to vector<2x64xf32>
    %25 = vector.extract_strided_slice %23 {offsets = [0, 0], sizes = [2, 64], strides = [1, 1]} : vector<2x96xf32> to vector<2x64xf32>
    %26 = arith.addf %24, %25 : vector<2x64xf32>
    %27 = arith.negf %26 : vector<2x64xf32>
    %28 = math.exp %27 : vector<2x64xf32>
    %cst_22 = arith.constant 1.000000e+00 : f32
    %29 = vector.broadcast %cst_22 : f32 to vector<2x64xf32>
    %30 = arith.addf %29, %28 : vector<2x64xf32>
    %31 = arith.divf %29, %30 : vector<2x64xf32>
    %32 = vector.extract_strided_slice %31 {offsets = [0, 0], sizes = [2, 32], strides = [1, 1]} : vector<2x64xf32> to vector<2x32xf32>
    %33 = vector.extract_strided_slice %31 {offsets = [0, 32], sizes = [2, 32], strides = [1, 1]} : vector<2x64xf32> to vector<2x32xf32>
    %34 = vector.extract_strided_slice %21 {offsets = [0, 64], sizes = [2, 32], strides = [1, 1]} : vector<2x96xf32> to vector<2x32xf32>
    %35 = vector.extract_strided_slice %23 {offsets = [0, 64], sizes = [2, 32], strides = [1, 1]} : vector<2x96xf32> to vector<2x32xf32>
    %36 = vector.broadcast %7 : vector<1x32xf32> to vector<2x32xf32>
    %37 = arith.addf %35, %36 : vector<2x32xf32>
    %38 = arith.mulf %32, %37 : vector<2x32xf32>
    %39 = arith.addf %34, %38 : vector<2x32xf32>
    %40 = math.tanh %39 : vector<2x32xf32>
    %cst_23 = arith.constant 1.000000e+00 : f32
    %41 = vector.broadcast %cst_23 : f32 to vector<2x32xf32>
    %42 = arith.subf %41, %33 : vector<2x32xf32>
    %43 = arith.subf %40, %13 : vector<2x32xf32>
    %44 = arith.mulf %42, %43 : vector<2x32xf32>
    %45 = arith.mulf %20, %44 : vector<2x32xf32>
    %46 = arith.addf %13, %45 : vector<2x32xf32>
    %47 = arith.truncf %46 : vector<2x32xf32> to vector<2x32xbf16>
    %cst_24 = arith.constant dense<0.000000e+00> : vector<2x96xf32>
    %48 = tpu.matmul %47, %2, %cst_24 {dimension_numbers = #tpu.dot_dimension_numbers<[1], [0], [0], [1], [0, 0, 1, 1], [], []>} : vector<2x32xbf16>, vector<32x96xbf16>, vector<2x96xf32> -> vector<2x96xf32>
    %49 = vector.broadcast %6 : vector<1x96xf32> to vector<2x96xf32>
    %50 = arith.addf %48, %49 : vector<2x96xf32>
    %51 = arith.truncf %14 : vector<2x32xf32> to vector<2x32xbf16>
    %cst_25 = arith.constant dense<0.000000e+00> : vector<2x96xf32>
    %52 = tpu.matmul %51, %4, %cst_25 {dimension_numbers = #tpu.dot_dimension_numbers<[1], [0], [0], [1], [0, 0, 1, 1], [], []>} : vector<2x32xbf16>, vector<32x96xbf16>, vector<2x96xf32> -> vector<2x96xf32>
    %53 = vector.extract_strided_slice %50 {offsets = [0, 0], sizes = [2, 64], strides = [1, 1]} : vector<2x96xf32> to vector<2x64xf32>
    %54 = vector.extract_strided_slice %52 {offsets = [0, 0], sizes = [2, 64], strides = [1, 1]} : vector<2x96xf32> to vector<2x64xf32>
    %55 = arith.addf %53, %54 : vector<2x64xf32>
    %56 = arith.negf %55 : vector<2x64xf32>
    %57 = math.exp %56 : vector<2x64xf32>
    %cst_26 = arith.constant 1.000000e+00 : f32
    %58 = vector.broadcast %cst_26 : f32 to vector<2x64xf32>
    %59 = arith.addf %58, %57 : vector<2x64xf32>
    %60 = arith.divf %58, %59 : vector<2x64xf32>
    %61 = vector.extract_strided_slice %60 {offsets = [0, 0], sizes = [2, 32], strides = [1, 1]} : vector<2x64xf32> to vector<2x32xf32>
    %62 = vector.extract_strided_slice %60 {offsets = [0, 32], sizes = [2, 32], strides = [1, 1]} : vector<2x64xf32> to vector<2x32xf32>
    %63 = vector.extract_strided_slice %50 {offsets = [0, 64], sizes = [2, 32], strides = [1, 1]} : vector<2x96xf32> to vector<2x32xf32>
    %64 = vector.extract_strided_slice %52 {offsets = [0, 64], sizes = [2, 32], strides = [1, 1]} : vector<2x96xf32> to vector<2x32xf32>
    %65 = vector.broadcast %8 : vector<1x32xf32> to vector<2x32xf32>
    %66 = arith.addf %64, %65 : vector<2x32xf32>
    %67 = arith.mulf %61, %66 : vector<2x32xf32>
    %68 = arith.addf %63, %67 : vector<2x32xf32>
    %69 = math.tanh %68 : vector<2x32xf32>
    %cst_27 = arith.constant 1.000000e+00 : f32
    %70 = vector.broadcast %cst_27 : f32 to vector<2x32xf32>
    %71 = arith.subf %70, %62 : vector<2x32xf32>
    %72 = arith.subf %69, %14 : vector<2x32xf32>
    %73 = arith.mulf %71, %72 : vector<2x32xf32>
    %74 = arith.mulf %20, %73 : vector<2x32xf32>
    %75 = arith.addf %14, %74 : vector<2x32xf32>
    %76 = arith.mulf %20, %75 : vector<2x32xf32>
    %c0_28 = arith.constant 0 : index
    %c0_29 = arith.constant 0 : index
    %77 = vector.load %arg18[%c0_28, %c0_29] : memref<16x32xf32, #tpu.memory_space<vmem>>, vector<2x32xf32>
    tpu.vector_store %arg18[%c0_28, %c0_29], %76 {strides = array<i32>} : memref<16x32xf32, #tpu.memory_space<vmem>>, vector<2x32xf32>,
    %c1_i32 = arith.constant 1 : i32
    %78 = vector.broadcast %c1_i32 : i32 to vector<2x1xi32>
    %79 = arith.cmpi sgt, %0, %78 : vector<2x1xi32>
    %80 = arith.extui %79 : vector<2x1xi1> to vector<2x1xi32>
    %81 = arith.sitofp %80 : vector<2x1xi32> to vector<2x1xf32>
    %82 = vector.shape_cast %81 : vector<2x1xf32> to vector<2x1xf32>
    %83 = vector.broadcast %82 : vector<2x1xf32> to vector<2x32xf32>
    %84 = vector.extract_strided_slice %12 {offsets = [2, 0], sizes = [2, 96], strides = [1, 1]} : vector<16x96xf32> to vector<2x96xf32>
    %85 = arith.truncf %46 : vector<2x32xf32> to vector<2x32xbf16>
    %cst_30 = arith.constant dense<0.000000e+00> : vector<2x96xf32>
    %86 = tpu.matmul %85, %3, %cst_30 {dimension_numbers = #tpu.dot_dimension_numbers<[1], [0], [0], [1], [0, 0, 1, 1], [], []>} : vector<2x32xbf16>, vector<32x96xbf16>, vector<2x96xf32> -> vector<2x96xf32>
    %87 = vector.extract_strided_slice %84 {offsets = [0, 0], sizes = [2, 64], strides = [1, 1]} : vector<2x96xf32> to vector<2x64xf32>
    %88 = vector.extract_strided_slice %86 {offsets = [0, 0], sizes = [2, 64], strides = [1, 1]} : vector<2x96xf32> to vector<2x64xf32>
    %89 = arith.addf %87, %88 : vector<2x64xf32>
    %90 = arith.negf %89 : vector<2x64xf32>
    %91 = math.exp %90 : vector<2x64xf32>
    %cst_31 = arith.constant 1.000000e+00 : f32
    %92 = vector.broadcast %cst_31 : f32 to vector<2x64xf32>
    %93 = arith.addf %92, %91 : vector<2x64xf32>
    %94 = arith.divf %92, %93 : vector<2x64xf32>
    %95 = vector.extract_strided_slice %94 {offsets = [0, 0], sizes = [2, 32], strides = [1, 1]} : vector<2x64xf32> to vector<2x32xf32>
    %96 = vector.extract_strided_slice %94 {offsets = [0, 32], sizes = [2, 32], strides = [1, 1]} : vector<2x64xf32> to vector<2x32xf32>
    %97 = vector.extract_strided_slice %84 {offsets = [0, 64], sizes = [2, 32], strides = [1, 1]} : vector<2x96xf32> to vector<2x32xf32>
    %98 = vector.extract_strided_slice %86 {offsets = [0, 64], sizes = [2, 32], strides = [1, 1]} : vector<2x96xf32> to vector<2x32xf32>
    %99 = vector.broadcast %7 : vector<1x32xf32> to vector<2x32xf32>
    %100 = arith.addf %98, %99 : vector<2x32xf32>
    %101 = arith.mulf %95, %100 : vector<2x32xf32>
    %102 = arith.addf %97, %101 : vector<2x32xf32>
    %103 = math.tanh %102 : vector<2x32xf32>
    %cst_32 = arith.constant 1.000000e+00 : f32
    %104 = vector.broadcast %cst_32 : f32 to vector<2x32xf32>
    %105 = arith.subf %104, %96 : vector<2x32xf32>
    %106 = arith.subf %103, %46 : vector<2x32xf32>
    %107 = arith.mulf %105, %106 : vector<2x32xf32>
    %108 = arith.mulf %83, %107 : vector<2x32xf32>
    %109 = arith.addf %46, %108 : vector<2x32xf32>
    %110 = arith.truncf %109 : vector<2x32xf32> to vector<2x32xbf16>
    %cst_33 = arith.constant dense<0.000000e+00> : vector<2x96xf32>
    %111 = tpu.matmul %110, %2, %cst_33 {dimension_numbers = #tpu.dot_dimension_numbers<[1], [0], [0], [1], [0, 0, 1, 1], [], []>} : vector<2x32xbf16>, vector<32x96xbf16>, vector<2x96xf32> -> vector<2x96xf32>
    %112 = vector.broadcast %6 : vector<1x96xf32> to vector<2x96xf32>
    %113 = arith.addf %111, %112 : vector<2x96xf32>
    %114 = arith.truncf %75 : vector<2x32xf32> to vector<2x32xbf16>
    %cst_34 = arith.constant dense<0.000000e+00> : vector<2x96xf32>
    %115 = tpu.matmul %114, %4, %cst_34 {dimension_numbers = #tpu.dot_dimension_numbers<[1], [0], [0], [1], [0, 0, 1, 1], [], []>} : vector<2x32xbf16>, vector<32x96xbf16>, vector<2x96xf32> -> vector<2x96xf32>
    %116 = vector.extract_strided_slice %113 {offsets = [0, 0], sizes = [2, 64], strides = [1, 1]} : vector<2x96xf32> to vector<2x64xf32>
    %117 = vector.extract_strided_slice %115 {offsets = [0, 0], sizes = [2, 64], strides = [1, 1]} : vector<2x96xf32> to vector<2x64xf32>
    %118 = arith.addf %116, %117 : vector<2x64xf32>
    %119 = arith.negf %118 : vector<2x64xf32>
    %120 = math.exp %119 : vector<2x64xf32>
    %cst_35 = arith.constant 1.000000e+00 : f32
    %121 = vector.broadcast %cst_35 : f32 to vector<2x64xf32>
    %122 = arith.addf %121, %120 : vector<2x64xf32>
    %123 = arith.divf %121, %122 : vector<2x64xf32>
    %124 = vector.extract_strided_slice %123 {offsets = [0, 0], sizes = [2, 32], strides = [1, 1]} : vector<2x64xf32> to vector<2x32xf32>
    %125 = vector.extract_strided_slice %123 {offsets = [0, 32], sizes = [2, 32], strides = [1, 1]} : vector<2x64xf32> to vector<2x32xf32>
    %126 = vector.extract_strided_slice %113 {offsets = [0, 64], sizes = [2, 32], strides = [1, 1]} : vector<2x96xf32> to vector<2x32xf32>
    %127 = vector.extract_strided_slice %115 {offsets = [0, 64], sizes = [2, 32], strides = [1, 1]} : vector<2x96xf32> to vector<2x32xf32>
    %128 = vector.broadcast %8 : vector<1x32xf32> to vector<2x32xf32>
    %129 = arith.addf %127, %128 : vector<2x32xf32>
    %130 = arith.mulf %124, %129 : vector<2x32xf32>
    %131 = arith.addf %126, %130 : vector<2x32xf32>
    %132 = math.tanh %131 : vector<2x32xf32>
    %cst_36 = arith.constant 1.000000e+00 : f32
    %133 = vector.broadcast %cst_36 : f32 to vector<2x32xf32>
    %134 = arith.subf %133, %125 : vector<2x32xf32>
    %135 = arith.subf %132, %75 : vector<2x32xf32>
    %136 = arith.mulf %134, %135 : vector<2x32xf32>
    %137 = arith.mulf %83, %136 : vector<2x32xf32>
    %138 = arith.addf %75, %137 : vector<2x32xf32>
    %139 = arith.mulf %83, %138 : vector<2x32xf32>
    %c2 = arith.constant 2 : index
    %c0_37 = arith.constant 0 : index
    %140 = vector.load %arg18[%c2, %c0_37] : memref<16x32xf32, #tpu.memory_space<vmem>>, vector<2x32xf32>
    tpu.vector_store %arg18[%c2, %c0_37], %139 {strides = array<i32>} : memref<16x32xf32, #tpu.memory_space<vmem>>, vector<2x32xf32>,
    %c2_i32 = arith.constant 2 : i32
    %141 = vector.broadcast %c2_i32 : i32 to vector<2x1xi32>
    %142 = arith.cmpi sgt, %0, %141 : vector<2x1xi32>
    %143 = arith.extui %142 : vector<2x1xi1> to vector<2x1xi32>
    %144 = arith.sitofp %143 : vector<2x1xi32> to vector<2x1xf32>
    %145 = vector.shape_cast %144 : vector<2x1xf32> to vector<2x1xf32>
    %146 = vector.broadcast %145 : vector<2x1xf32> to vector<2x32xf32>
    %147 = vector.extract_strided_slice %12 {offsets = [4, 0], sizes = [2, 96], strides = [1, 1]} : vector<16x96xf32> to vector<2x96xf32>
    %148 = arith.truncf %109 : vector<2x32xf32> to vector<2x32xbf16>
    %cst_38 = arith.constant dense<0.000000e+00> : vector<2x96xf32>
    %149 = tpu.matmul %148, %3, %cst_38 {dimension_numbers = #tpu.dot_dimension_numbers<[1], [0], [0], [1], [0, 0, 1, 1], [], []>} : vector<2x32xbf16>, vector<32x96xbf16>, vector<2x96xf32> -> vector<2x96xf32>
    %150 = vector.extract_strided_slice %147 {offsets = [0, 0], sizes = [2, 64], strides = [1, 1]} : vector<2x96xf32> to vector<2x64xf32>
    %151 = vector.extract_strided_slice %149 {offsets = [0, 0], sizes = [2, 64], strides = [1, 1]} : vector<2x96xf32> to vector<2x64xf32>
    %152 = arith.addf %150, %151 : vector<2x64xf32>
    %153 = arith.negf %152 : vector<2x64xf32>
    %154 = math.exp %153 : vector<2x64xf32>
    %cst_39 = arith.constant 1.000000e+00 : f32
    %155 = vector.broadcast %cst_39 : f32 to vector<2x64xf32>
    %156 = arith.addf %155, %154 : vector<2x64xf32>
    %157 = arith.divf %155, %156 : vector<2x64xf32>
    %158 = vector.extract_strided_slice %157 {offsets = [0, 0], sizes = [2, 32], strides = [1, 1]} : vector<2x64xf32> to vector<2x32xf32>
    %159 = vector.extract_strided_slice %157 {offsets = [0, 32], sizes = [2, 32], strides = [1, 1]} : vector<2x64xf32> to vector<2x32xf32>
    %160 = vector.extract_strided_slice %147 {offsets = [0, 64], sizes = [2, 32], strides = [1, 1]} : vector<2x96xf32> to vector<2x32xf32>
    %161 = vector.extract_strided_slice %149 {offsets = [0, 64], sizes = [2, 32], strides = [1, 1]} : vector<2x96xf32> to vector<2x32xf32>
    %162 = vector.broadcast %7 : vector<1x32xf32> to vector<2x32xf32>
    %163 = arith.addf %161, %162 : vector<2x32xf32>
    %164 = arith.mulf %158, %163 : vector<2x32xf32>
    %165 = arith.addf %160, %164 : vector<2x32xf32>
    %166 = math.tanh %165 : vector<2x32xf32>
    %cst_40 = arith.constant 1.000000e+00 : f32
    %167 = vector.broadcast %cst_40 : f32 to vector<2x32xf32>
    %168 = arith.subf %167, %159 : vector<2x32xf32>
    %169 = arith.subf %166, %109 : vector<2x32xf32>
    %170 = arith.mulf %168, %169 : vector<2x32xf32>
    %171 = arith.mulf %146, %170 : vector<2x32xf32>
    %172 = arith.addf %109, %171 : vector<2x32xf32>
    %173 = arith.truncf %172 : vector<2x32xf32> to vector<2x32xbf16>
    %cst_41 = arith.constant dense<0.000000e+00> : vector<2x96xf32>
    %174 = tpu.matmul %173, %2, %cst_41 {dimension_numbers = #tpu.dot_dimension_numbers<[1], [0], [0], [1], [0, 0, 1, 1], [], []>} : vector<2x32xbf16>, vector<32x96xbf16>, vector<2x96xf32> -> vector<2x96xf32>
    %175 = vector.broadcast %6 : vector<1x96xf32> to vector<2x96xf32>
    %176 = arith.addf %174, %175 : vector<2x96xf32>
    %177 = arith.truncf %138 : vector<2x32xf32> to vector<2x32xbf16>
    %cst_42 = arith.constant dense<0.000000e+00> : vector<2x96xf32>
    %178 = tpu.matmul %177, %4, %cst_42 {dimension_numbers = #tpu.dot_dimension_numbers<[1], [0], [0], [1], [0, 0, 1, 1], [], []>} : vector<2x32xbf16>, vector<32x96xbf16>, vector<2x96xf32> -> vector<2x96xf32>
    %179 = vector.extract_strided_slice %176 {offsets = [0, 0], sizes = [2, 64], strides = [1, 1]} : vector<2x96xf32> to vector<2x64xf32>
    %180 = vector.extract_strided_slice %178 {offsets = [0, 0], sizes = [2, 64], strides = [1, 1]} : vector<2x96xf32> to vector<2x64xf32>
    %181 = arith.addf %179, %180 : vector<2x64xf32>
    %182 = arith.negf %181 : vector<2x64xf32>
    %183 = math.exp %182 : vector<2x64xf32>
    %cst_43 = arith.constant 1.000000e+00 : f32
    %184 = vector.broadcast %cst_43 : f32 to vector<2x64xf32>
    %185 = arith.addf %184, %183 : vector<2x64xf32>
    %186 = arith.divf %184, %185 : vector<2x64xf32>
    %187 = vector.extract_strided_slice %186 {offsets = [0, 0], sizes = [2, 32], strides = [1, 1]} : vector<2x64xf32> to vector<2x32xf32>
    %188 = vector.extract_strided_slice %186 {offsets = [0, 32], sizes = [2, 32], strides = [1, 1]} : vector<2x64xf32> to vector<2x32xf32>
    %189 = vector.extract_strided_slice %176 {offsets = [0, 64], sizes = [2, 32], strides = [1, 1]} : vector<2x96xf32> to vector<2x32xf32>
    %190 = vector.extract_strided_slice %178 {offsets = [0, 64], sizes = [2, 32], strides = [1, 1]} : vector<2x96xf32> to vector<2x32xf32>
    %191 = vector.broadcast %8 : vector<1x32xf32> to vector<2x32xf32>
    %192 = arith.addf %190, %191 : vector<2x32xf32>
    %193 = arith.mulf %187, %192 : vector<2x32xf32>
    %194 = arith.addf %189, %193 : vector<2x32xf32>
    %195 = math.tanh %194 : vector<2x32xf32>
    %cst_44 = arith.constant 1.000000e+00 : f32
    %196 = vector.broadcast %cst_44 : f32 to vector<2x32xf32>
    %197 = arith.subf %196, %188 : vector<2x32xf32>
    %198 = arith.subf %195, %138 : vector<2x32xf32>
    %199 = arith.mulf %197, %198 : vector<2x32xf32>
    %200 = arith.mulf %146, %199 : vector<2x32xf32>
    %201 = arith.addf %138, %200 : vector<2x32xf32>
    %202 = arith.mulf %146, %201 : vector<2x32xf32>
    %c4 = arith.constant 4 : index
    %c0_45 = arith.constant 0 : index
    %203 = vector.load %arg18[%c4, %c0_45] : memref<16x32xf32, #tpu.memory_space<vmem>>, vector<2x32xf32>
    tpu.vector_store %arg18[%c4, %c0_45], %202 {strides = array<i32>} : memref<16x32xf32, #tpu.memory_space<vmem>>, vector<2x32xf32>,
    %c3_i32 = arith.constant 3 : i32
    %204 = vector.broadcast %c3_i32 : i32 to vector<2x1xi32>
    %205 = arith.cmpi sgt, %0, %204 : vector<2x1xi32>
    %206 = arith.extui %205 : vector<2x1xi1> to vector<2x1xi32>
    %207 = arith.sitofp %206 : vector<2x1xi32> to vector<2x1xf32>
    %208 = vector.shape_cast %207 : vector<2x1xf32> to vector<2x1xf32>
    %209 = vector.broadcast %208 : vector<2x1xf32> to vector<2x32xf32>
    %210 = vector.extract_strided_slice %12 {offsets = [6, 0], sizes = [2, 96], strides = [1, 1]} : vector<16x96xf32> to vector<2x96xf32>
    %211 = arith.truncf %172 : vector<2x32xf32> to vector<2x32xbf16>
    %cst_46 = arith.constant dense<0.000000e+00> : vector<2x96xf32>
    %212 = tpu.matmul %211, %3, %cst_46 {dimension_numbers = #tpu.dot_dimension_numbers<[1], [0], [0], [1], [0, 0, 1, 1], [], []>} : vector<2x32xbf16>, vector<32x96xbf16>, vector<2x96xf32> -> vector<2x96xf32>
    %213 = vector.extract_strided_slice %210 {offsets = [0, 0], sizes = [2, 64], strides = [1, 1]} : vector<2x96xf32> to vector<2x64xf32>
    %214 = vector.extract_strided_slice %212 {offsets = [0, 0], sizes = [2, 64], strides = [1, 1]} : vector<2x96xf32> to vector<2x64xf32>
    %215 = arith.addf %213, %214 : vector<2x64xf32>
    %216 = arith.negf %215 : vector<2x64xf32>
    %217 = math.exp %216 : vector<2x64xf32>
    %cst_47 = arith.constant 1.000000e+00 : f32
    %218 = vector.broadcast %cst_47 : f32 to vector<2x64xf32>
    %219 = arith.addf %218, %217 : vector<2x64xf32>
    %220 = arith.divf %218, %219 : vector<2x64xf32>
    %221 = vector.extract_strided_slice %220 {offsets = [0, 0], sizes = [2, 32], strides = [1, 1]} : vector<2x64xf32> to vector<2x32xf32>
    %222 = vector.extract_strided_slice %220 {offsets = [0, 32], sizes = [2, 32], strides = [1, 1]} : vector<2x64xf32> to vector<2x32xf32>
    %223 = vector.extract_strided_slice %210 {offsets = [0, 64], sizes = [2, 32], strides = [1, 1]} : vector<2x96xf32> to vector<2x32xf32>
    %224 = vector.extract_strided_slice %212 {offsets = [0, 64], sizes = [2, 32], strides = [1, 1]} : vector<2x96xf32> to vector<2x32xf32>
    %225 = vector.broadcast %7 : vector<1x32xf32> to vector<2x32xf32>
    %226 = arith.addf %224, %225 : vector<2x32xf32>
    %227 = arith.mulf %221, %226 : vector<2x32xf32>
    %228 = arith.addf %223, %227 : vector<2x32xf32>
    %229 = math.tanh %228 : vector<2x32xf32>
    %cst_48 = arith.constant 1.000000e+00 : f32
    %230 = vector.broadcast %cst_48 : f32 to vector<2x32xf32>
    %231 = arith.subf %230, %222 : vector<2x32xf32>
    %232 = arith.subf %229, %172 : vector<2x32xf32>
    %233 = arith.mulf %231, %232 : vector<2x32xf32>
    %234 = arith.mulf %209, %233 : vector<2x32xf32>
    %235 = arith.addf %172, %234 : vector<2x32xf32>
    %236 = arith.truncf %235 : vector<2x32xf32> to vector<2x32xbf16>
    %cst_49 = arith.constant dense<0.000000e+00> : vector<2x96xf32>
    %237 = tpu.matmul %236, %2, %cst_49 {dimension_numbers = #tpu.dot_dimension_numbers<[1], [0], [0], [1], [0, 0, 1, 1], [], []>} : vector<2x32xbf16>, vector<32x96xbf16>, vector<2x96xf32> -> vector<2x96xf32>
    %238 = vector.broadcast %6 : vector<1x96xf32> to vector<2x96xf32>
    %239 = arith.addf %237, %238 : vector<2x96xf32>
    %240 = arith.truncf %201 : vector<2x32xf32> to vector<2x32xbf16>
    %cst_50 = arith.constant dense<0.000000e+00> : vector<2x96xf32>
    %241 = tpu.matmul %240, %4, %cst_50 {dimension_numbers = #tpu.dot_dimension_numbers<[1], [0], [0], [1], [0, 0, 1, 1], [], []>} : vector<2x32xbf16>, vector<32x96xbf16>, vector<2x96xf32> -> vector<2x96xf32>
    %242 = vector.extract_strided_slice %239 {offsets = [0, 0], sizes = [2, 64], strides = [1, 1]} : vector<2x96xf32> to vector<2x64xf32>
    %243 = vector.extract_strided_slice %241 {offsets = [0, 0], sizes = [2, 64], strides = [1, 1]} : vector<2x96xf32> to vector<2x64xf32>
    %244 = arith.addf %242, %243 : vector<2x64xf32>
    %245 = arith.negf %244 : vector<2x64xf32>
    %246 = math.exp %245 : vector<2x64xf32>
    %cst_51 = arith.constant 1.000000e+00 : f32
    %247 = vector.broadcast %cst_51 : f32 to vector<2x64xf32>
    %248 = arith.addf %247, %246 : vector<2x64xf32>
    %249 = arith.divf %247, %248 : vector<2x64xf32>
    %250 = vector.extract_strided_slice %249 {offsets = [0, 0], sizes = [2, 32], strides = [1, 1]} : vector<2x64xf32> to vector<2x32xf32>
    %251 = vector.extract_strided_slice %249 {offsets = [0, 32], sizes = [2, 32], strides = [1, 1]} : vector<2x64xf32> to vector<2x32xf32>
    %252 = vector.extract_strided_slice %239 {offsets = [0, 64], sizes = [2, 32], strides = [1, 1]} : vector<2x96xf32> to vector<2x32xf32>
    %253 = vector.extract_strided_slice %241 {offsets = [0, 64], sizes = [2, 32], strides = [1, 1]} : vector<2x96xf32> to vector<2x32xf32>
    %254 = vector.broadcast %8 : vector<1x32xf32> to vector<2x32xf32>
    %255 = arith.addf %253, %254 : vector<2x32xf32>
    %256 = arith.mulf %250, %255 : vector<2x32xf32>
    %257 = arith.addf %252, %256 : vector<2x32xf32>
    %258 = math.tanh %257 : vector<2x32xf32>
    %cst_52 = arith.constant 1.000000e+00 : f32
    %259 = vector.broadcast %cst_52 : f32 to vector<2x32xf32>
    %260 = arith.subf %259, %251 : vector<2x32xf32>
    %261 = arith.subf %258, %201 : vector<2x32xf32>
    %262 = arith.mulf %260, %261 : vector<2x32xf32>
    %263 = arith.mulf %209, %262 : vector<2x32xf32>
    %264 = arith.addf %201, %263 : vector<2x32xf32>
    %265 = arith.mulf %209, %264 : vector<2x32xf32>
    %c6 = arith.constant 6 : index
    %c0_53 = arith.constant 0 : index
    %266 = vector.load %arg18[%c6, %c0_53] : memref<16x32xf32, #tpu.memory_space<vmem>>, vector<2x32xf32>
    tpu.vector_store %arg18[%c6, %c0_53], %265 {strides = array<i32>} : memref<16x32xf32, #tpu.memory_space<vmem>>, vector<2x32xf32>,
    %c4_i32 = arith.constant 4 : i32
    %267 = vector.broadcast %c4_i32 : i32 to vector<2x1xi32>
    %268 = arith.cmpi sgt, %0, %267 : vector<2x1xi32>
    %269 = arith.extui %268 : vector<2x1xi1> to vector<2x1xi32>
    %270 = arith.sitofp %269 : vector<2x1xi32> to vector<2x1xf32>
    %271 = vector.shape_cast %270 : vector<2x1xf32> to vector<2x1xf32>
    %272 = vector.broadcast %271 : vector<2x1xf32> to vector<2x32xf32>
    %273 = vector.extract_strided_slice %12 {offsets = [8, 0], sizes = [2, 96], strides = [1, 1]} : vector<16x96xf32> to vector<2x96xf32>
    %274 = arith.truncf %235 : vector<2x32xf32> to vector<2x32xbf16>
    %cst_54 = arith.constant dense<0.000000e+00> : vector<2x96xf32>
    %275 = tpu.matmul %274, %3, %cst_54 {dimension_numbers = #tpu.dot_dimension_numbers<[1], [0], [0], [1], [0, 0, 1, 1], [], []>} : vector<2x32xbf16>, vector<32x96xbf16>, vector<2x96xf32> -> vector<2x96xf32>
    %276 = vector.extract_strided_slice %273 {offsets = [0, 0], sizes = [2, 64], strides = [1, 1]} : vector<2x96xf32> to vector<2x64xf32>
    %277 = vector.extract_strided_slice %275 {offsets = [0, 0], sizes = [2, 64], strides = [1, 1]} : vector<2x96xf32> to vector<2x64xf32>
    %278 = arith.addf %276, %277 : vector<2x64xf32>
    %279 = arith.negf %278 : vector<2x64xf32>
    %280 = math.exp %279 : vector<2x64xf32>
    %cst_55 = arith.constant 1.000000e+00 : f32
    %281 = vector.broadcast %cst_55 : f32 to vector<2x64xf32>
    %282 = arith.addf %281, %280 : vector<2x64xf32>
    %283 = arith.divf %281, %282 : vector<2x64xf32>
    %284 = vector.extract_strided_slice %283 {offsets = [0, 0], sizes = [2, 32], strides = [1, 1]} : vector<2x64xf32> to vector<2x32xf32>
    %285 = vector.extract_strided_slice %283 {offsets = [0, 32], sizes = [2, 32], strides = [1, 1]} : vector<2x64xf32> to vector<2x32xf32>
    %286 = vector.extract_strided_slice %273 {offsets = [0, 64], sizes = [2, 32], strides = [1, 1]} : vector<2x96xf32> to vector<2x32xf32>
    %287 = vector.extract_strided_slice %275 {offsets = [0, 64], sizes = [2, 32], strides = [1, 1]} : vector<2x96xf32> to vector<2x32xf32>
    %288 = vector.broadcast %7 : vector<1x32xf32> to vector<2x32xf32>
    %289 = arith.addf %287, %288 : vector<2x32xf32>
    %290 = arith.mulf %284, %289 : vector<2x32xf32>
    %291 = arith.addf %286, %290 : vector<2x32xf32>
    %292 = math.tanh %291 : vector<2x32xf32>
    %cst_56 = arith.constant 1.000000e+00 : f32
    %293 = vector.broadcast %cst_56 : f32 to vector<2x32xf32>
    %294 = arith.subf %293, %285 : vector<2x32xf32>
    %295 = arith.subf %292, %235 : vector<2x32xf32>
    %296 = arith.mulf %294, %295 : vector<2x32xf32>
    %297 = arith.mulf %272, %296 : vector<2x32xf32>
    %298 = arith.addf %235, %297 : vector<2x32xf32>
    %299 = arith.truncf %298 : vector<2x32xf32> to vector<2x32xbf16>
    %cst_57 = arith.constant dense<0.000000e+00> : vector<2x96xf32>
    %300 = tpu.matmul %299, %2, %cst_57 {dimension_numbers = #tpu.dot_dimension_numbers<[1], [0], [0], [1], [0, 0, 1, 1], [], []>} : vector<2x32xbf16>, vector<32x96xbf16>, vector<2x96xf32> -> vector<2x96xf32>
    %301 = vector.broadcast %6 : vector<1x96xf32> to vector<2x96xf32>
    %302 = arith.addf %300, %301 : vector<2x96xf32>
    %303 = arith.truncf %264 : vector<2x32xf32> to vector<2x32xbf16>
    %cst_58 = arith.constant dense<0.000000e+00> : vector<2x96xf32>
    %304 = tpu.matmul %303, %4, %cst_58 {dimension_numbers = #tpu.dot_dimension_numbers<[1], [0], [0], [1], [0, 0, 1, 1], [], []>} : vector<2x32xbf16>, vector<32x96xbf16>, vector<2x96xf32> -> vector<2x96xf32>
    %305 = vector.extract_strided_slice %302 {offsets = [0, 0], sizes = [2, 64], strides = [1, 1]} : vector<2x96xf32> to vector<2x64xf32>
    %306 = vector.extract_strided_slice %304 {offsets = [0, 0], sizes = [2, 64], strides = [1, 1]} : vector<2x96xf32> to vector<2x64xf32>
    %307 = arith.addf %305, %306 : vector<2x64xf32>
    %308 = arith.negf %307 : vector<2x64xf32>
    %309 = math.exp %308 : vector<2x64xf32>
    %cst_59 = arith.constant 1.000000e+00 : f32
    %310 = vector.broadcast %cst_59 : f32 to vector<2x64xf32>
    %311 = arith.addf %310, %309 : vector<2x64xf32>
    %312 = arith.divf %310, %311 : vector<2x64xf32>
    %313 = vector.extract_strided_slice %312 {offsets = [0, 0], sizes = [2, 32], strides = [1, 1]} : vector<2x64xf32> to vector<2x32xf32>
    %314 = vector.extract_strided_slice %312 {offsets = [0, 32], sizes = [2, 32], strides = [1, 1]} : vector<2x64xf32> to vector<2x32xf32>
    %315 = vector.extract_strided_slice %302 {offsets = [0, 64], sizes = [2, 32], strides = [1, 1]} : vector<2x96xf32> to vector<2x32xf32>
    %316 = vector.extract_strided_slice %304 {offsets = [0, 64], sizes = [2, 32], strides = [1, 1]} : vector<2x96xf32> to vector<2x32xf32>
    %317 = vector.broadcast %8 : vector<1x32xf32> to vector<2x32xf32>
    %318 = arith.addf %316, %317 : vector<2x32xf32>
    %319 = arith.mulf %313, %318 : vector<2x32xf32>
    %320 = arith.addf %315, %319 : vector<2x32xf32>
    %321 = math.tanh %320 : vector<2x32xf32>
    %cst_60 = arith.constant 1.000000e+00 : f32
    %322 = vector.broadcast %cst_60 : f32 to vector<2x32xf32>
    %323 = arith.subf %322, %314 : vector<2x32xf32>
    %324 = arith.subf %321, %264 : vector<2x32xf32>
    %325 = arith.mulf %323, %324 : vector<2x32xf32>
    %326 = arith.mulf %272, %325 : vector<2x32xf32>
    %327 = arith.addf %264, %326 : vector<2x32xf32>
    %328 = arith.mulf %272, %327 : vector<2x32xf32>
    %c8 = arith.constant 8 : index
    %c0_61 = arith.constant 0 : index
    %329 = vector.load %arg18[%c8, %c0_61] : memref<16x32xf32, #tpu.memory_space<vmem>>, vector<2x32xf32>
    tpu.vector_store %arg18[%c8, %c0_61], %328 {strides = array<i32>} : memref<16x32xf32, #tpu.memory_space<vmem>>, vector<2x32xf32>,
    %c5_i32 = arith.constant 5 : i32
    %330 = vector.broadcast %c5_i32 : i32 to vector<2x1xi32>
    %331 = arith.cmpi sgt, %0, %330 : vector<2x1xi32>
    %332 = arith.extui %331 : vector<2x1xi1> to vector<2x1xi32>
    %333 = arith.sitofp %332 : vector<2x1xi32> to vector<2x1xf32>
    %334 = vector.shape_cast %333 : vector<2x1xf32> to vector<2x1xf32>
    %335 = vector.broadcast %334 : vector<2x1xf32> to vector<2x32xf32>
    %336 = vector.extract_strided_slice %12 {offsets = [10, 0], sizes = [2, 96], strides = [1, 1]} : vector<16x96xf32> to vector<2x96xf32>
    %337 = arith.truncf %298 : vector<2x32xf32> to vector<2x32xbf16>
    %cst_62 = arith.constant dense<0.000000e+00> : vector<2x96xf32>
    %338 = tpu.matmul %337, %3, %cst_62 {dimension_numbers = #tpu.dot_dimension_numbers<[1], [0], [0], [1], [0, 0, 1, 1], [], []>} : vector<2x32xbf16>, vector<32x96xbf16>, vector<2x96xf32> -> vector<2x96xf32>
    %339 = vector.extract_strided_slice %336 {offsets = [0, 0], sizes = [2, 64], strides = [1, 1]} : vector<2x96xf32> to vector<2x64xf32>
    %340 = vector.extract_strided_slice %338 {offsets = [0, 0], sizes = [2, 64], strides = [1, 1]} : vector<2x96xf32> to vector<2x64xf32>
    %341 = arith.addf %339, %340 : vector<2x64xf32>
    %342 = arith.negf %341 : vector<2x64xf32>
    %343 = math.exp %342 : vector<2x64xf32>
    %cst_63 = arith.constant 1.000000e+00 : f32
    %344 = vector.broadcast %cst_63 : f32 to vector<2x64xf32>
    %345 = arith.addf %344, %343 : vector<2x64xf32>
    %346 = arith.divf %344, %345 : vector<2x64xf32>
    %347 = vector.extract_strided_slice %346 {offsets = [0, 0], sizes = [2, 32], strides = [1, 1]} : vector<2x64xf32> to vector<2x32xf32>
    %348 = vector.extract_strided_slice %346 {offsets = [0, 32], sizes = [2, 32], strides = [1, 1]} : vector<2x64xf32> to vector<2x32xf32>
    %349 = vector.extract_strided_slice %336 {offsets = [0, 64], sizes = [2, 32], strides = [1, 1]} : vector<2x96xf32> to vector<2x32xf32>
    %350 = vector.extract_strided_slice %338 {offsets = [0, 64], sizes = [2, 32], strides = [1, 1]} : vector<2x96xf32> to vector<2x32xf32>
    %351 = vector.broadcast %7 : vector<1x32xf32> to vector<2x32xf32>
    %352 = arith.addf %350, %351 : vector<2x32xf32>
    %353 = arith.mulf %347, %352 : vector<2x32xf32>
    %354 = arith.addf %349, %353 : vector<2x32xf32>
    %355 = math.tanh %354 : vector<2x32xf32>
    %cst_64 = arith.constant 1.000000e+00 : f32
    %356 = vector.broadcast %cst_64 : f32 to vector<2x32xf32>
    %357 = arith.subf %356, %348 : vector<2x32xf32>
    %358 = arith.subf %355, %298 : vector<2x32xf32>
    %359 = arith.mulf %357, %358 : vector<2x32xf32>
    %360 = arith.mulf %335, %359 : vector<2x32xf32>
    %361 = arith.addf %298, %360 : vector<2x32xf32>
    %362 = arith.truncf %361 : vector<2x32xf32> to vector<2x32xbf16>
    %cst_65 = arith.constant dense<0.000000e+00> : vector<2x96xf32>
    %363 = tpu.matmul %362, %2, %cst_65 {dimension_numbers = #tpu.dot_dimension_numbers<[1], [0], [0], [1], [0, 0, 1, 1], [], []>} : vector<2x32xbf16>, vector<32x96xbf16>, vector<2x96xf32> -> vector<2x96xf32>
    %364 = vector.broadcast %6 : vector<1x96xf32> to vector<2x96xf32>
    %365 = arith.addf %363, %364 : vector<2x96xf32>
    %366 = arith.truncf %327 : vector<2x32xf32> to vector<2x32xbf16>
    %cst_66 = arith.constant dense<0.000000e+00> : vector<2x96xf32>
    %367 = tpu.matmul %366, %4, %cst_66 {dimension_numbers = #tpu.dot_dimension_numbers<[1], [0], [0], [1], [0, 0, 1, 1], [], []>} : vector<2x32xbf16>, vector<32x96xbf16>, vector<2x96xf32> -> vector<2x96xf32>
    %368 = vector.extract_strided_slice %365 {offsets = [0, 0], sizes = [2, 64], strides = [1, 1]} : vector<2x96xf32> to vector<2x64xf32>
    %369 = vector.extract_strided_slice %367 {offsets = [0, 0], sizes = [2, 64], strides = [1, 1]} : vector<2x96xf32> to vector<2x64xf32>
    %370 = arith.addf %368, %369 : vector<2x64xf32>
    %371 = arith.negf %370 : vector<2x64xf32>
    %372 = math.exp %371 : vector<2x64xf32>
    %cst_67 = arith.constant 1.000000e+00 : f32
    %373 = vector.broadcast %cst_67 : f32 to vector<2x64xf32>
    %374 = arith.addf %373, %372 : vector<2x64xf32>
    %375 = arith.divf %373, %374 : vector<2x64xf32>
    %376 = vector.extract_strided_slice %375 {offsets = [0, 0], sizes = [2, 32], strides = [1, 1]} : vector<2x64xf32> to vector<2x32xf32>
    %377 = vector.extract_strided_slice %375 {offsets = [0, 32], sizes = [2, 32], strides = [1, 1]} : vector<2x64xf32> to vector<2x32xf32>
    %378 = vector.extract_strided_slice %365 {offsets = [0, 64], sizes = [2, 32], strides = [1, 1]} : vector<2x96xf32> to vector<2x32xf32>
    %379 = vector.extract_strided_slice %367 {offsets = [0, 64], sizes = [2, 32], strides = [1, 1]} : vector<2x96xf32> to vector<2x32xf32>
    %380 = vector.broadcast %8 : vector<1x32xf32> to vector<2x32xf32>
    %381 = arith.addf %379, %380 : vector<2x32xf32>
    %382 = arith.mulf %376, %381 : vector<2x32xf32>
    %383 = arith.addf %378, %382 : vector<2x32xf32>
    %384 = math.tanh %383 : vector<2x32xf32>
    %cst_68 = arith.constant 1.000000e+00 : f32
    %385 = vector.broadcast %cst_68 : f32 to vector<2x32xf32>
    %386 = arith.subf %385, %377 : vector<2x32xf32>
    %387 = arith.subf %384, %327 : vector<2x32xf32>
    %388 = arith.mulf %386, %387 : vector<2x32xf32>
    %389 = arith.mulf %335, %388 : vector<2x32xf32>
    %390 = arith.addf %327, %389 : vector<2x32xf32>
    %391 = arith.mulf %335, %390 : vector<2x32xf32>
    %c10 = arith.constant 10 : index
    %c0_69 = arith.constant 0 : index
    %392 = vector.load %arg18[%c10, %c0_69] : memref<16x32xf32, #tpu.memory_space<vmem>>, vector<2x32xf32>
    tpu.vector_store %arg18[%c10, %c0_69], %391 {strides = array<i32>} : memref<16x32xf32, #tpu.memory_space<vmem>>, vector<2x32xf32>,
    %c6_i32 = arith.constant 6 : i32
    %393 = vector.broadcast %c6_i32 : i32 to vector<2x1xi32>
    %394 = arith.cmpi sgt, %0, %393 : vector<2x1xi32>
    %395 = arith.extui %394 : vector<2x1xi1> to vector<2x1xi32>
    %396 = arith.sitofp %395 : vector<2x1xi32> to vector<2x1xf32>
    %397 = vector.shape_cast %396 : vector<2x1xf32> to vector<2x1xf32>
    %398 = vector.broadcast %397 : vector<2x1xf32> to vector<2x32xf32>
    %399 = vector.extract_strided_slice %12 {offsets = [12, 0], sizes = [2, 96], strides = [1, 1]} : vector<16x96xf32> to vector<2x96xf32>
    %400 = arith.truncf %361 : vector<2x32xf32> to vector<2x32xbf16>
    %cst_70 = arith.constant dense<0.000000e+00> : vector<2x96xf32>
    %401 = tpu.matmul %400, %3, %cst_70 {dimension_numbers = #tpu.dot_dimension_numbers<[1], [0], [0], [1], [0, 0, 1, 1], [], []>} : vector<2x32xbf16>, vector<32x96xbf16>, vector<2x96xf32> -> vector<2x96xf32>
    %402 = vector.extract_strided_slice %399 {offsets = [0, 0], sizes = [2, 64], strides = [1, 1]} : vector<2x96xf32> to vector<2x64xf32>
    %403 = vector.extract_strided_slice %401 {offsets = [0, 0], sizes = [2, 64], strides = [1, 1]} : vector<2x96xf32> to vector<2x64xf32>
    %404 = arith.addf %402, %403 : vector<2x64xf32>
    %405 = arith.negf %404 : vector<2x64xf32>
    %406 = math.exp %405 : vector<2x64xf32>
    %cst_71 = arith.constant 1.000000e+00 : f32
    %407 = vector.broadcast %cst_71 : f32 to vector<2x64xf32>
    %408 = arith.addf %407, %406 : vector<2x64xf32>
    %409 = arith.divf %407, %408 : vector<2x64xf32>
    %410 = vector.extract_strided_slice %409 {offsets = [0, 0], sizes = [2, 32], strides = [1, 1]} : vector<2x64xf32> to vector<2x32xf32>
    %411 = vector.extract_strided_slice %409 {offsets = [0, 32], sizes = [2, 32], strides = [1, 1]} : vector<2x64xf32> to vector<2x32xf32>
    %412 = vector.extract_strided_slice %399 {offsets = [0, 64], sizes = [2, 32], strides = [1, 1]} : vector<2x96xf32> to vector<2x32xf32>
    %413 = vector.extract_strided_slice %401 {offsets = [0, 64], sizes = [2, 32], strides = [1, 1]} : vector<2x96xf32> to vector<2x32xf32>
    %414 = vector.broadcast %7 : vector<1x32xf32> to vector<2x32xf32>
    %415 = arith.addf %413, %414 : vector<2x32xf32>
    %416 = arith.mulf %410, %415 : vector<2x32xf32>
    %417 = arith.addf %412, %416 : vector<2x32xf32>
    %418 = math.tanh %417 : vector<2x32xf32>
    %cst_72 = arith.constant 1.000000e+00 : f32
    %419 = vector.broadcast %cst_72 : f32 to vector<2x32xf32>
    %420 = arith.subf %419, %411 : vector<2x32xf32>
    %421 = arith.subf %418, %361 : vector<2x32xf32>
    %422 = arith.mulf %420, %421 : vector<2x32xf32>
    %423 = arith.mulf %398, %422 : vector<2x32xf32>
    %424 = arith.addf %361, %423 : vector<2x32xf32>
    %425 = arith.truncf %424 : vector<2x32xf32> to vector<2x32xbf16>
    %cst_73 = arith.constant dense<0.000000e+00> : vector<2x96xf32>
    %426 = tpu.matmul %425, %2, %cst_73 {dimension_numbers = #tpu.dot_dimension_numbers<[1], [0], [0], [1], [0, 0, 1, 1], [], []>} : vector<2x32xbf16>, vector<32x96xbf16>, vector<2x96xf32> -> vector<2x96xf32>
    %427 = vector.broadcast %6 : vector<1x96xf32> to vector<2x96xf32>
    %428 = arith.addf %426, %427 : vector<2x96xf32>
    %429 = arith.truncf %390 : vector<2x32xf32> to vector<2x32xbf16>
    %cst_74 = arith.constant dense<0.000000e+00> : vector<2x96xf32>
    %430 = tpu.matmul %429, %4, %cst_74 {dimension_numbers = #tpu.dot_dimension_numbers<[1], [0], [0], [1], [0, 0, 1, 1], [], []>} : vector<2x32xbf16>, vector<32x96xbf16>, vector<2x96xf32> -> vector<2x96xf32>
    %431 = vector.extract_strided_slice %428 {offsets = [0, 0], sizes = [2, 64], strides = [1, 1]} : vector<2x96xf32> to vector<2x64xf32>
    %432 = vector.extract_strided_slice %430 {offsets = [0, 0], sizes = [2, 64], strides = [1, 1]} : vector<2x96xf32> to vector<2x64xf32>
    %433 = arith.addf %431, %432 : vector<2x64xf32>
    %434 = arith.negf %433 : vector<2x64xf32>
    %435 = math.exp %434 : vector<2x64xf32>
    %cst_75 = arith.constant 1.000000e+00 : f32
    %436 = vector.broadcast %cst_75 : f32 to vector<2x64xf32>
    %437 = arith.addf %436, %435 : vector<2x64xf32>
    %438 = arith.divf %436, %437 : vector<2x64xf32>
    %439 = vector.extract_strided_slice %438 {offsets = [0, 0], sizes = [2, 32], strides = [1, 1]} : vector<2x64xf32> to vector<2x32xf32>
    %440 = vector.extract_strided_slice %438 {offsets = [0, 32], sizes = [2, 32], strides = [1, 1]} : vector<2x64xf32> to vector<2x32xf32>
    %441 = vector.extract_strided_slice %428 {offsets = [0, 64], sizes = [2, 32], strides = [1, 1]} : vector<2x96xf32> to vector<2x32xf32>
    %442 = vector.extract_strided_slice %430 {offsets = [0, 64], sizes = [2, 32], strides = [1, 1]} : vector<2x96xf32> to vector<2x32xf32>
    %443 = vector.broadcast %8 : vector<1x32xf32> to vector<2x32xf32>
    %444 = arith.addf %442, %443 : vector<2x32xf32>
    %445 = arith.mulf %439, %444 : vector<2x32xf32>
    %446 = arith.addf %441, %445 : vector<2x32xf32>
    %447 = math.tanh %446 : vector<2x32xf32>
    %cst_76 = arith.constant 1.000000e+00 : f32
    %448 = vector.broadcast %cst_76 : f32 to vector<2x32xf32>
    %449 = arith.subf %448, %440 : vector<2x32xf32>
    %450 = arith.subf %447, %390 : vector<2x32xf32>
    %451 = arith.mulf %449, %450 : vector<2x32xf32>
    %452 = arith.mulf %398, %451 : vector<2x32xf32>
    %453 = arith.addf %390, %452 : vector<2x32xf32>
    %454 = arith.mulf %398, %453 : vector<2x32xf32>
    %c12 = arith.constant 12 : index
    %c0_77 = arith.constant 0 : index
    %455 = vector.load %arg18[%c12, %c0_77] : memref<16x32xf32, #tpu.memory_space<vmem>>, vector<2x32xf32>
    tpu.vector_store %arg18[%c12, %c0_77], %454 {strides = array<i32>} : memref<16x32xf32, #tpu.memory_space<vmem>>, vector<2x32xf32>,
    %c7_i32 = arith.constant 7 : i32
    %456 = vector.broadcast %c7_i32 : i32 to vector<2x1xi32>
    %457 = arith.cmpi sgt, %0, %456 : vector<2x1xi32>
    %458 = arith.extui %457 : vector<2x1xi1> to vector<2x1xi32>
    %459 = arith.sitofp %458 : vector<2x1xi32> to vector<2x1xf32>
    %460 = vector.shape_cast %459 : vector<2x1xf32> to vector<2x1xf32>
    %461 = vector.broadcast %460 : vector<2x1xf32> to vector<2x32xf32>
    %462 = vector.extract_strided_slice %12 {offsets = [14, 0], sizes = [2, 96], strides = [1, 1]} : vector<16x96xf32> to vector<2x96xf32>
    %463 = arith.truncf %424 : vector<2x32xf32> to vector<2x32xbf16>
    %cst_78 = arith.constant dense<0.000000e+00> : vector<2x96xf32>
    %464 = tpu.matmul %463, %3, %cst_78 {dimension_numbers = #tpu.dot_dimension_numbers<[1], [0], [0], [1], [0, 0, 1, 1], [], []>} : vector<2x32xbf16>, vector<32x96xbf16>, vector<2x96xf32> -> vector<2x96xf32>
    %465 = vector.extract_strided_slice %462 {offsets = [0, 0], sizes = [2, 64], strides = [1, 1]} : vector<2x96xf32> to vector<2x64xf32>
    %466 = vector.extract_strided_slice %464 {offsets = [0, 0], sizes = [2, 64], strides = [1, 1]} : vector<2x96xf32> to vector<2x64xf32>
    %467 = arith.addf %465, %466 : vector<2x64xf32>
    %468 = arith.negf %467 : vector<2x64xf32>
    %469 = math.exp %468 : vector<2x64xf32>
    %cst_79 = arith.constant 1.000000e+00 : f32
    %470 = vector.broadcast %cst_79 : f32 to vector<2x64xf32>
    %471 = arith.addf %470, %469 : vector<2x64xf32>
    %472 = arith.divf %470, %471 : vector<2x64xf32>
    %473 = vector.extract_strided_slice %472 {offsets = [0, 0], sizes = [2, 32], strides = [1, 1]} : vector<2x64xf32> to vector<2x32xf32>
    %474 = vector.extract_strided_slice %472 {offsets = [0, 32], sizes = [2, 32], strides = [1, 1]} : vector<2x64xf32> to vector<2x32xf32>
    %475 = vector.extract_strided_slice %462 {offsets = [0, 64], sizes = [2, 32], strides = [1, 1]} : vector<2x96xf32> to vector<2x32xf32>
    %476 = vector.extract_strided_slice %464 {offsets = [0, 64], sizes = [2, 32], strides = [1, 1]} : vector<2x96xf32> to vector<2x32xf32>
    %477 = vector.broadcast %7 : vector<1x32xf32> to vector<2x32xf32>
    %478 = arith.addf %476, %477 : vector<2x32xf32>
    %479 = arith.mulf %473, %478 : vector<2x32xf32>
    %480 = arith.addf %475, %479 : vector<2x32xf32>
    %481 = math.tanh %480 : vector<2x32xf32>
    %cst_80 = arith.constant 1.000000e+00 : f32
    %482 = vector.broadcast %cst_80 : f32 to vector<2x32xf32>
    %483 = arith.subf %482, %474 : vector<2x32xf32>
    %484 = arith.subf %481, %424 : vector<2x32xf32>
    %485 = arith.mulf %483, %484 : vector<2x32xf32>
    %486 = arith.mulf %461, %485 : vector<2x32xf32>
    %487 = arith.addf %424, %486 : vector<2x32xf32>
    %488 = arith.truncf %487 : vector<2x32xf32> to vector<2x32xbf16>
    %cst_81 = arith.constant dense<0.000000e+00> : vector<2x96xf32>
    %489 = tpu.matmul %488, %2, %cst_81 {dimension_numbers = #tpu.dot_dimension_numbers<[1], [0], [0], [1], [0, 0, 1, 1], [], []>} : vector<2x32xbf16>, vector<32x96xbf16>, vector<2x96xf32> -> vector<2x96xf32>
    %490 = vector.broadcast %6 : vector<1x96xf32> to vector<2x96xf32>
    %491 = arith.addf %489, %490 : vector<2x96xf32>
    %492 = arith.truncf %453 : vector<2x32xf32> to vector<2x32xbf16>
    %cst_82 = arith.constant dense<0.000000e+00> : vector<2x96xf32>
    %493 = tpu.matmul %492, %4, %cst_82 {dimension_numbers = #tpu.dot_dimension_numbers<[1], [0], [0], [1], [0, 0, 1, 1], [], []>} : vector<2x32xbf16>, vector<32x96xbf16>, vector<2x96xf32> -> vector<2x96xf32>
    %494 = vector.extract_strided_slice %491 {offsets = [0, 0], sizes = [2, 64], strides = [1, 1]} : vector<2x96xf32> to vector<2x64xf32>
    %495 = vector.extract_strided_slice %493 {offsets = [0, 0], sizes = [2, 64], strides = [1, 1]} : vector<2x96xf32> to vector<2x64xf32>
    %496 = arith.addf %494, %495 : vector<2x64xf32>
    %497 = arith.negf %496 : vector<2x64xf32>
    %498 = math.exp %497 : vector<2x64xf32>
    %cst_83 = arith.constant 1.000000e+00 : f32
    %499 = vector.broadcast %cst_83 : f32 to vector<2x64xf32>
    %500 = arith.addf %499, %498 : vector<2x64xf32>
    %501 = arith.divf %499, %500 : vector<2x64xf32>
    %502 = vector.extract_strided_slice %501 {offsets = [0, 0], sizes = [2, 32], strides = [1, 1]} : vector<2x64xf32> to vector<2x32xf32>
    %503 = vector.extract_strided_slice %501 {offsets = [0, 32], sizes = [2, 32], strides = [1, 1]} : vector<2x64xf32> to vector<2x32xf32>
    %504 = vector.extract_strided_slice %491 {offsets = [0, 64], sizes = [2, 32], strides = [1, 1]} : vector<2x96xf32> to vector<2x32xf32>
    %505 = vector.extract_strided_slice %493 {offsets = [0, 64], sizes = [2, 32], strides = [1, 1]} : vector<2x96xf32> to vector<2x32xf32>
    %506 = vector.broadcast %8 : vector<1x32xf32> to vector<2x32xf32>
    %507 = arith.addf %505, %506 : vector<2x32xf32>
    %508 = arith.mulf %502, %507 : vector<2x32xf32>
    %509 = arith.addf %504, %508 : vector<2x32xf32>
    %510 = math.tanh %509 : vector<2x32xf32>
    %cst_84 = arith.constant 1.000000e+00 : f32
    %511 = vector.broadcast %cst_84 : f32 to vector<2x32xf32>
    %512 = arith.subf %511, %503 : vector<2x32xf32>
    %513 = arith.subf %510, %453 : vector<2x32xf32>
    %514 = arith.mulf %512, %513 : vector<2x32xf32>
    %515 = arith.mulf %461, %514 : vector<2x32xf32>
    %516 = arith.addf %453, %515 : vector<2x32xf32>
    %517 = arith.mulf %461, %516 : vector<2x32xf32>
    %c14 = arith.constant 14 : index
    %c0_85 = arith.constant 0 : index
    %518 = vector.load %arg18[%c14, %c0_85] : memref<16x32xf32, #tpu.memory_space<vmem>>, vector<2x32xf32>
    tpu.vector_store %arg18[%c14, %c0_85], %517 {strides = array<i32>} : memref<16x32xf32, #tpu.memory_space<vmem>>, vector<2x32xf32>,
    %c0_86 = arith.constant 0 : index
    %c0_87 = arith.constant 0 : index
    %519 = vector.load %arg17[%c0_86, %c0_87] : memref<2x32xf32, #tpu.memory_space<vmem>>, vector<2x32xf32>
    tpu.vector_store %arg17[%c0_86, %c0_87], %516 {strides = array<i32>} : memref<2x32xf32, #tpu.memory_space<vmem>>, vector<2x32xf32>,
    %c0_88 = arith.constant 0 : index
    %c0_89 = arith.constant 0 : index
    %520 = vector.load %arg18[%c0_88, %c0_89] : memref<16x32xf32, #tpu.memory_space<vmem>>, vector<16x32xf32>
    %c0_90 = arith.constant 0 : index
    %c0_91 = arith.constant 0 : index
    %521 = vector.load %arg10[%c0_90, %c0_91] : memref<32x32xf32, #tpu.memory_space<vmem>>, vector<32x32xf32>
    %cst_92 = arith.constant dense<0.000000e+00> : vector<16x32xf32>
    %522 = tpu.matmul %520, %521, %cst_92 {dimension_numbers = #tpu.dot_dimension_numbers<[1], [0], [0], [1], [0, 0, 1, 1], [], []>} : vector<16x32xf32>, vector<32x32xf32>, vector<16x32xf32> -> vector<16x32xf32>
    %c0_93 = arith.constant 0 : index
    %c0_94 = arith.constant 0 : index
    %523 = vector.load %arg11[%c0_93, %c0_94] : memref<1x32xf32, #tpu.memory_space<vmem>>, vector<1x32xf32>
    %524 = vector.broadcast %523 : vector<1x32xf32> to vector<16x32xf32>
    %525 = arith.addf %522, %524 : vector<16x32xf32>
    %cst_95 = arith.constant dense<0.000000e+00> : vector<32xf32>
    %526 = vector.multi_reduction <add>, %525, %cst_95 [0] : vector<16x32xf32> to vector<32xf32>
    %527 = vector.shape_cast %526 : vector<32xf32> to vector<1x32xf32>
    %cst_96 = arith.constant 6.250000e-02 : f32
    %528 = vector.broadcast %cst_96 : f32 to vector<1x32xf32>
    %529 = arith.mulf %527, %528 : vector<1x32xf32>
    %530 = vector.broadcast %529 : vector<1x32xf32> to vector<16x32xf32>
    %531 = arith.subf %525, %530 : vector<16x32xf32>
    %532 = arith.mulf %531, %531 : vector<16x32xf32>
    %cst_97 = arith.constant dense<0.000000e+00> : vector<32xf32>
    %533 = vector.multi_reduction <add>, %532, %cst_97 [0] : vector<16x32xf32> to vector<32xf32>
    %534 = vector.shape_cast %533 : vector<32xf32> to vector<1x32xf32>
    %cst_98 = arith.constant 6.250000e-02 : f32
    %535 = vector.broadcast %cst_98 : f32 to vector<1x32xf32>
    %536 = arith.mulf %534, %535 : vector<1x32xf32>
    %cst_99 = arith.constant 9.99999974E-6 : f32
    %537 = vector.broadcast %cst_99 : f32 to vector<1x32xf32>
    %538 = arith.addf %536, %537 : vector<1x32xf32>
    %539 = math.rsqrt %538 : vector<1x32xf32>
    %c0_100 = arith.constant 0 : index
    %c0_101 = arith.constant 0 : index
    %540 = vector.load %arg12[%c0_100, %c0_101] : memref<1x32xf32, #tpu.memory_space<vmem>>, vector<1x32xf32>
    %541 = arith.mulf %539, %540 : vector<1x32xf32>
    %542 = vector.broadcast %541 : vector<1x32xf32> to vector<16x32xf32>
    %543 = arith.mulf %531, %542 : vector<16x32xf32>
    %c0_102 = arith.constant 0 : index
    %c0_103 = arith.constant 0 : index
    %544 = vector.load %arg13[%c0_102, %c0_103] : memref<1x32xf32, #tpu.memory_space<vmem>>, vector<1x32xf32>
    %545 = vector.broadcast %544 : vector<1x32xf32> to vector<16x32xf32>
    %546 = arith.addf %543, %545 : vector<16x32xf32>
    %cst_104 = arith.constant 0.000000e+00 : f32
    %547 = vector.broadcast %cst_104 : f32 to vector<16x32xf32>
    %548 = arith.maximumf %546, %547 : vector<16x32xf32>
    %c0_105 = arith.constant 0 : index
    %c0_106 = arith.constant 0 : index
    %549 = vector.load %arg14[%c0_105, %c0_106] : memref<32x32xf32, #tpu.memory_space<vmem>>, vector<32x32xf32>
    %cst_107 = arith.constant dense<0.000000e+00> : vector<16x32xf32>
    %550 = tpu.matmul %548, %549, %cst_107 {dimension_numbers = #tpu.dot_dimension_numbers<[1], [0], [0], [1], [0, 0, 1, 1], [], []>} : vector<16x32xf32>, vector<32x32xf32>, vector<16x32xf32> -> vector<16x32xf32>
    %c0_108 = arith.constant 0 : index
    %c0_109 = arith.constant 0 : index
    %551 = vector.load %arg15[%c0_108, %c0_109] : memref<1x32xf32, #tpu.memory_space<vmem>>, vector<1x32xf32>
    %552 = vector.broadcast %551 : vector<1x32xf32> to vector<16x32xf32>
    %553 = arith.addf %550, %552 : vector<16x32xf32>
    %c0_110 = arith.constant 0 : index
    %c0_111 = arith.constant 0 : index
    %554 = vector.load %arg16[%c0_110, %c0_111] : memref<16x32xf32, #tpu.memory_space<vmem>>, vector<16x32xf32>
    tpu.vector_store %arg16[%c0_110, %c0_111], %553 {strides = array<i32>} : memref<16x32xf32, #tpu.memory_space<vmem>>, vector<16x32xf32>,
    return
  }
}

</mosaic_0001>

<bundles_post_ra>
// kernel: tpu_custom_call.1
= control target key start
LH: loop header
LB: loop body
LE: loop exit
PB: predicated region body
PF: predicated region fallthrough
CT: control target
= control target key end

     0   :  { %s3798_s0 = inlined_call_operand.vmem [shape: s32[2,1], index: 0, kind: input, shape index: {}]   ;;  %s3799_s1 = inlined_call_operand.hbm [shape: bf16[16,64], index: 1, kind: input, shape index: {}]   ;;  %s3800_s2 = inlined_call_operand.hbm [shape: bf16[64,96], index: 2, kind: input, shape index: {}]   ;;  %s3801_s3 = inlined_call_operand.hbm [shape: bf16[32,96], index: 3, kind: input, shape index: {}]   ;;  %s3802_s4 = inlined_call_operand.vmem [shape: f32[1,96], index: 4, kind: input, shape index: {}]   ;;  %s3803_s5 = inlined_call_operand.vmem [shape: f32[1,32], index: 5, kind: input, shape index: {}]   ;;  %s3804_s6 = inlined_call_operand.hbm [shape: bf16[32,96], index: 6, kind: input, shape index: {}]   ;;  %s3805_s7 = inlined_call_operand.hbm [shape: bf16[32,96], index: 7, kind: input, shape index: {}]   ;;  %s3806_s8 = inlined_call_operand.vmem [shape: f32[1,96], index: 8, kind: input, shape index: {}]   ;;  %s3807_s9 = inlined_call_operand.vmem [shape: f32[1,32], index: 9, kind: input, shape index: {}]   ;;  %s3808_s10 = inlined_call_operand.hbm [shape: f32[32,32], index: 10, kind: input, shape index: {}]   ;;  %s3809_s11 = inlined_call_operand.vmem [shape: f32[1,32], index: 11, kind: input, shape index: {}]   ;;  %s3810_s12 = inlined_call_operand.vmem [shape: f32[1,32], index: 12, kind: input, shape index: {}]   ;;  %s3811_s13 = inlined_call_operand.vmem [shape: f32[1,32], index: 13, kind: input, shape index: {}]   ;;  %s3812_s14 = inlined_call_operand.hbm [shape: f32[32,32], index: 14, kind: input, shape index: {}]   ;;  %s3813_s15 = inlined_call_operand.vmem [shape: f32[1,32], index: 15, kind: input, shape index: {}]   ;;  %s3814_s16 = inlined_call_operand.hbm [shape: f32[16,32], index: 16, kind: output, shape index: {0}]   ;;  %s3815_s17 = inlined_call_operand.hbm [shape: f32[2,32], index: 17, kind: output, shape index: {1}]  }
   0x1   :  { %3817 = sst [smem:[#allocation24_spill]] %s3798_s0 }
   0x2   :  { %3818 = sst [smem:[#allocation25_spill]] %s3799_s1 }
   0x3   :  { %23 = vsyncpa [#allocation4], 0 }
   0x4   :  { %24 = vsyncpa [#allocation7], 0 }
   0x5   :  { %25 = vsyncpa [#allocation10], 0 }
   0x6   :  { %26 = vsyncpa [#allocation13], 0 }
   0x7   :  { %27 = vsyncpa [#allocation5], 0 }
   0x8   :  { %28 = vsyncpa [#allocation17], 0  ;;  %s3071_s24 = smov [#allocation6]   ;;  %s3072_s26 = smov [#allocation9]  }
   0x9   :  { %s48_s25 = sshll.u32 %s3071_s24, 4  ;;  %s76_s27 = sshll.u32 %s3072_s26, 4  ;;  %s49_s25 = int_to_ptr.vmem [resolvable:$true] %s48_s25  ;;  %s77_s27 = int_to_ptr.vmem [resolvable:$true] %s76_s27 }
   0xa   :  { %s2887_s28 = scalar_lea.vmem %s49_s25, 512  ;;  %p2892_p1 = scmp.lt.s32.totalorder %s49_s25, %s49_s25 }
   0xb   :  { %p2888_p0 = scmp.ne.s32.totalorder %s49_s25, %s2887_s28  ;;  %p2893_p2 = scmp.lt.s32.totalorder %s2887_s28, %s2887_s28 }
   0xd   :  { %p2894_p3 = por %p2893_p2, %p2892_p1 }
   0xf   :  { %p2895_p4 = pnand %p2894_p3, %p2888_p0 }
  0x11   :  { %2898 = shalt.err (!%p2895_p4)
}
  0x12   :  { %s3073_s29 = smov 64   ;;  %s3074_s0 = smov 4  }
  0x13   :  { %54 = dma.hbm_to_vmem [thread:$0]  %s3800_s2, 512, %s49_s25, [#allocation7], %s3073_s29, %s3073_s29, %s3074_s0  }
  0x14   :  { %s2907_s19 = scalar_lea.vmem %s77_s27, 256  ;;  %p2912_p6 = scmp.lt.s32.totalorder %s77_s27, %s77_s27 }
  0x15   :  { %p2908_p5 = scmp.ne.s32.totalorder %s77_s27, %s2907_s19  ;;  %p2913_p7 = scmp.lt.s32.totalorder %s2907_s19, %s2907_s19 }
  0x17   :  { %p2914_p8 = por %p2913_p7, %p2912_p6 }
  0x19   :  { %p2915_p9 = pnand %p2914_p8, %p2908_p5 }
  0x1b   :  { %2918 = shalt.err (!%p2915_p9)
}
  0x1c   :  { %82 = dma.hbm_to_vmem [thread:$0]  %s3804_s6, 256, %s77_s27, [#allocation10], %s3073_s29, %s3073_s29, %s3074_s0  }
  0x1d   :  { %s3075_s21 = smov [#allocation12]  }
  0x1e   :  { %s104_s22 = sshll.u32 %s3075_s21, 4  ;;  %s105_s22 = int_to_ptr.vmem [resolvable:$true] %s104_s22 }
  0x1f   :  { %s2927_s23 = scalar_lea.vmem %s105_s22, 512  ;;  %p2932_p11 = scmp.lt.s32.totalorder %s105_s22, %s105_s22 }
  0x20   :  { %p2928_p10 = scmp.ne.s32.totalorder %s105_s22, %s2927_s23  ;;  %p2933_p12 = scmp.lt.s32.totalorder %s2927_s23, %s2927_s23 }
  0x22   :  { %p2934_p13 = por %p2933_p12, %p2932_p11 }
  0x24   :  { %p2935_p0 = pnand %p2934_p13, %p2928_p10 }
  0x26   :  { %2938 = shalt.err (!%p2935_p0)
}
  0x27   :  { %s3076_s2 = smov 128   ;;  %s3077_s24 = smov 8  }
  0x28   :  { %110 = dma.hbm_to_vmem [thread:$0]  %s3808_s10, 512, %s105_s22, [#allocation13], %s3076_s2, %s3076_s2, %s3077_s24  }
  0x29   :  { %s3078_s6 = smov [#allocation3]   ;;  %s3079_s28 = smov [#allocation8]  }
  0x2a   :  { %s36_s27 = sshll.u32 %s3078_s6, 4  ;;  %s60_s30 = sshll.u32 %s3079_s28, 4  ;;  %s37_s27 = int_to_ptr.vmem [resolvable:$true] %s36_s27  ;;  %s61_s30 = int_to_ptr.vmem [resolvable:$true] %s60_s30 }
  0x2b   :  { %s2947_s18 = scalar_lea.vmem %s37_s27, 128  ;;  %p2952_p2 = scmp.lt.s32.totalorder %s37_s27, %s37_s27 }
  0x2c   :  { %p2948_p1 = scmp.ne.s32.totalorder %s37_s27, %s2947_s18  ;;  %p2953_p3 = scmp.lt.s32.totalorder %s2947_s18, %s2947_s18 }
  0x2e   :  { %p2954_p4 = por %p2953_p3, %p2952_p2 }
  0x30   :  { %p2955_p5 = pnand %p2954_p4, %p2948_p1 }
  0x32   :  { %2958 = shalt.err (!%p2955_p5)
}
  0x33   :  { %s3819_s20 = sld [smem:[#allocation25_spill]]  ;;  %s2967_s10 = scalar_lea.vmem %s61_s30, 256 }
  0x34   :  { %p2968_p6 = scmp.ne.s32.totalorder %s61_s30, %s2967_s10  ;;  %p2972_p7 = scmp.lt.s32.totalorder %s61_s30, %s61_s30 }
  0x35   :  { %p2973_p8 = scmp.lt.s32.totalorder %s2967_s10, %s2967_s10 }
  0x37   :  { %p2974_p9 = por %p2973_p8, %p2972_p7 }
  0x39   :  { %42 = dma.hbm_to_vmem [thread:$0]  %s3819_s20, 128, %s37_s27, [#allocation4], %s3073_s29, %s3073_s29, %s3074_s0  }
  0x3a   :  { %p2975_p10 = pnand %p2974_p9, %p2968_p6 }
  0x3c   :  { %2978 = shalt.err (!%p2975_p10)
}
  0x3d   :  { %66 = dma.hbm_to_vmem [thread:$0]  %s3801_s3, 256, %s61_s30, [#allocation7], %s3073_s29, %s3073_s29, %s3074_s0  }
  0x3e   :  { %s3080_s23 = smov [#allocation11]   ;;  %s3081_s26 = smov [#allocation14]  }
  0x3f   :  { %s88_s25 = sshll.u32 %s3080_s23, 4  ;;  %s122_s6 = sshll.u32 %s3081_s26, 4  ;;  %s89_s25 = int_to_ptr.vmem [resolvable:$true] %s88_s25  ;;  %s123_s6 = int_to_ptr.vmem [resolvable:$true] %s122_s6 }
  0x40   :  { %s2987_s27 = scalar_lea.vmem %s89_s25, 256  ;;  %p2992_p12 = scmp.lt.s32.totalorder %s89_s25, %s89_s25 }
  0x41   :  { %p2988_p11 = scmp.ne.s32.totalorder %s89_s25, %s2987_s27  ;;  %p2993_p13 = scmp.lt.s32.totalorder %s2987_s27, %s2987_s27 }
  0x43   :  { %p2994_p0 = por %p2993_p13, %p2992_p12 }
  0x45   :  { %p2995_p1 = pnand %p2994_p0, %p2988_p11 }
  0x47   :  { %2998 = shalt.err (!%p2995_p1)
}
  0x48   :  { %94 = dma.hbm_to_vmem [thread:$0]  %s3805_s7, 256, %s89_s25, [#allocation10], %s3073_s29, %s3073_s29, %s3074_s0  }
  0x49   :  { %s3007_s3 = scalar_lea.vmem %s123_s6, 512  ;;  %p3012_p3 = scmp.lt.s32.totalorder %s123_s6, %s123_s6 }
  0x4a   :  { %p3008_p2 = scmp.ne.s32.totalorder %s123_s6, %s3007_s3  ;;  %p3013_p4 = scmp.lt.s32.totalorder %s3007_s3, %s3007_s3 }
  0x4c   :  { %p3014_p5 = por %p3013_p4, %p3012_p3 }
  0x4e   :  { %p3015_p6 = pnand %p3014_p5, %p3008_p2 }
  0x50   :  { %3018 = shalt.err (!%p3015_p6)
}
  0x51   :  { %128 = dma.hbm_to_vmem [thread:$0]  %s3812_s14, 512, %s123_s6, [#allocation13], %s3076_s2, %s3076_s2, %s3077_s24  }
  0x52   :  { %3059 = dma.done.wait [#allocation4], 128  }
  0x53   :  { %3060 = vsyncadd [#allocation4], 4294967168 }
  0x54   :  { %3061 = dma.done.wait [#allocation7], 768  }
  0x55   :  { %3062 = vsyncadd [#allocation7], 4294966528 }
  0x56   :  { %3063 = dma.done.wait [#allocation10], 512  }
  0x57   :  { %3064 = vsyncadd [#allocation10], 4294966784 }
  0x58   :  { %3065 = dma.done.wait [#allocation13], 1024  }
  0x59   :  { %3066 = vsyncadd [#allocation13], 4294966272  ;;  %v3082_v0 = vmov 0.0   ;;  %vm3083_vm0 = vmmov 0   ;;  %v3084_v1 = vmov 0   ;;  %v2762_v2 = vld [vmem:[#allocation6 + $0x18] sm:$0xff]  }
  0x5a   :  { %2516 = vmatprep.subr.bf16.mxu0 %v3082_v0  ;;  %2528 = vmatprep.subr.bf16.mxu1 %v3082_v0  ;;  %v3229_v3 = vld [vmem:[#allocation8 + $0x8] sm:$0xff]   ;;  %v2764_v4 = vld [vmem:[#allocation6 + $0x10] sm:$0xff]   ;;  %v3233_v5 = vld [vmem:[#allocation8] sm:$0xff]   ;;  %vm215_vm1 = vcmask 523264   ;;  %s3820_s10 = sld [smem:[#allocation24_spill]]  ;;  %vm280_vm3 = vcmask 261120  }
  0x5b   :  { %2532 = vmatprep.mubr.msk.bf16.mxu1 %vm3083_vm0, %v3082_v0  ;;  %2524 = vmatprep.mubr.msk.bf16.mxu0 %vm3083_vm0, %v3082_v0  ;;  %v2766_v6 = vld [vmem:[#allocation6 + $0x8] sm:$0xff]   ;;  %v2767_v8 = vld [vmem:[#allocation6] sm:$0xff]   ;;  %v2768_v9 = vld [vmem:[#allocation3] sm:$0xff]   ;;  %s3086_s21 = smov 32   ;;  %vm516_vm11 = vcmask 254976   ;;  %s3087_s19 = smov [#allocation16]  }
  0x5c   :  { %2760 = vset.pattern.permute.xlu1 %v3084_v1  ;;  %2761 = vset.pattern.permute.xlu0 %v3084_v1  ;;  %v2369_v7 = vld [vmem:[%s3803_s5] ss:$0 sm:$0xff]  ;;  %v3271_v34 = vld [vmem:[#allocation9 + $0x8] sm:$0xff]   ;;  %v3277_v36 = vld [vmem:[#allocation9] sm:$0xff]  }
  0x5d   :  { %2517 = vmatpush3.bf16.msra.mxu0 %v2762_v2  ;;  %2529 = vmatpush3.bf16.msra.mxu1 %v3229_v3  ;;  %v2358_v18 = vld [vmem:[%s3802_s4] ss:$0 sm:$0xff]  ;;  %v3279_v37 = vld [vmem:[#allocation11] sm:$0xff]   ;;  %s3085_s4 = smov 96  }
  0x5e   :  { %2518 = vmatprep.subr.bf16.mxu0 %v3082_v0  ;;  %2530 = vmatprep.subr.bf16.mxu1 %v3082_v0  ;;  %v3273_v35 = vld [vmem:[#allocation11 + $0x8] sm:$0xff]  }
  0x5f   :  { %336 = vrot.lane.b32.xlu0 %v2369_v7, %s3073_s29 }
  0x60   :  { %v3265_v27 = vld [vmem:[%s3820_s10] sm:$0x3] }
  0x61   :  { %2519 = vmatpush3.bf16.msra.mxu0 %v2764_v4  ;;  %2531 = vmatpush3.bf16.msra.mxu1 %v3233_v5  ;;  %vm260_vm2 = vcmp.gt.s32.totalorder %v3265_v27, 0  ;;  %vm518_vm4 = vcmp.gt.s32.totalorder %v3265_v27, 1  ;;  %vm744_vm5 = vcmp.gt.s32.totalorder %v3265_v27, 2  ;;  %vm970_vm6 = vcmp.gt.s32.totalorder %v3265_v27, 3 }
  0x62   :  { %2520 = vmatprep.subr.bf16.mxu0 %v3082_v0  ;;  %2536 = vmatprep.subr.bf16.mxu1 %v3082_v0  ;;  %v2365_v31 = vsel %vm260_vm2, 1.0, %v3082_v0  ;;  %vm1196_vm7 = vcmp.gt.s32.totalorder %v3265_v27, 4  ;;  %vm1408_vm8 = vcmp.gt.s32.totalorder %v3265_v27, 5 }
  0x64   :  { %2533 = vmatmul.mubr.bf16.vlgmr.msra.gmra.mxu1 %v3084_v1 }
  0x65   :  { %2521 = vmatpush3.bf16.msra.mxu0 %v2766_v6  ;;  %2540 = vmatprep.mubr.msk.bf16.mxu1 %vm3083_vm0, %v3082_v0 }
  0x66   :  { %2522 = vmatprep.subr.bf16.mxu0 %v3082_v0  ;;  %2537 = vmatpush3.bf16.msra.mxu1 %v3271_v34 }
  0x67   :  { %2538 = vmatprep.subr.bf16.mxu1 %v3082_v0 }
  0x69   :  { %2523 = vmatpush3.bf16.msra.mxu0 %v2767_v8  ;;  %v2378_v8 = vsel %vm518_vm4, 1.0, %v3082_v0 }
  0x6a   :  { %2544 = vmatprep.subr.bf16.mxu0 %v3082_v0  ;;  %2539 = vmatpush3.bf16.msra.mxu1 %v3277_v36 }
  0x6b   :  { %2552 = vmatprep.subr.bf16.mxu1 %v3082_v0 }
  0x6c   :  { %2525 = vmatmul.mubr.msk.bf16.vlgmr.msra.gmra.mxu0 %vm215_vm1, %v2768_v9 }
  0x6d   :  { %2548 = vmatprep.mubr.msk.bf16.mxu0 %vm3083_vm0, %v3082_v0  ;;  %2545 = vmatpush3.bf16.msra.mxu0 %v3273_v35 }
  0x6e   :  { %2546 = vmatprep.subr.bf16.mxu0 %v3082_v0 }
  0x71   :  { %2547 = vmatpush3.bf16.msra.mxu0 %v3279_v37 }
  0x72   :  { %2560 = vmatprep.subr.bf16.mxu0 %v3082_v0 }
  0x74   :  { %2549 = vmatmul.mubr.bf16.vlgmr.msra.gmra.mxu0 %v3084_v1 }
  0x75   :  { %2561 = vmatpush3.bf16.msra.mxu0 %v3271_v34  ;;  %2564 = vmatprep.mubr.msk.bf16.mxu0 %vm3083_vm0, %v3082_v0 }
  0x76   :  { %2562 = vmatprep.subr.bf16.mxu0 %v3082_v0 }
  0x79   :  { %2563 = vmatpush3.bf16.msra.mxu0 %v3277_v36 }
  0x7a   :  { %2576 = vmatprep.subr.bf16.mxu0 %v3082_v0 }
  0xd1   :  { %v3250_v10 = vpop.permute.xlu0 %336 }
 0x124   :  { %v318_v11 = vpop.f32.mrf.mxu1 }
 0x125   :  { %v339_v12 = vadd.f32 %v3250_v10, %v318_v11 }
 0x126   :  { %v2534_v13 = vpop.f32.mrf.mxu1 }
 0x127   :  { %341 = vrot.lane.b32.xlu0 %v339_v12, %s3073_s29 }
 0x128   :  { %v321_v14 = vpop.f32.mrf.mxu1 }
 0x12a   :  { %v2535_v15 = vpop.f32.mrf.mxu1 }
 0x12c   :  { %v253_v16 = vpop.f32.mrf.mxu0 }
 0x12d   :  { %v3259_v22 = vadd.f32 %v2358_v18, %v253_v16 }
 0x12e   :  { %v2526_v17 = vpop.f32.mrf.mxu0 }
 0x12f   :  { %v324_v23 = vadd.f32 %v318_v11, %v3259_v22 }
 0x130   :  { %v256_v19 = vpop.f32.mrf.mxu0 }
 0x131   :  { %v3257_v20 = vadd.f32 %v2358_v18, %v256_v19  ;;  %v2368_v24 = vmul.f32 -1.442695, %v324_v23 }
 0x132   :  { %v2527_v21 = vpop.f32.mrf.mxu0 }
 0x133   :  { %2773 = vpow2.f32 %v2368_v24 }
 0x134   :  { %v3317_v46 = vpop.f32.mrf.mxu0 }
 0x136   :  { %v2550_v47 = vpop.f32.mrf.mxu0 }
 0x138   :  { %v473_v48 = vpop.f32.mrf.mxu0 }
 0x13a   :  { %v2551_v49 = vpop.f32.mrf.mxu0 }
 0x140   :  { %v2774_v25 = vpop.eup %2773 }
 0x141   :  { %v328_v26 = vadd.f32 1.0, %v2774_v25 }
 0x143   :  { %2775 = vrcp.f32 %v328_v26 }
 0x150   :  { %v2776_v28 = vpop.eup %2775 }
 0x151   :  { %v351_v39 = vsub.f32 1.0, %v2776_v28 }
 0x199   :  { %v342_v29 = vpop.permute.xlu0 %341 }
 0x19a   :  { %v344_v30 = vmul.f32 %v2776_v28, %v342_v29  ;;  %v2377_v28 = vld [vmem:[%s3807_s9] ss:$0 sm:$0xff] }
 0x19c   :  { %346 = vrot.lane.b32.xlu1 %v344_v30, %s3073_s29 }
 0x1a0   :  { %265 = vperm.xlu1 %2760, %v2365_v31  }
 0x20e   :  { %v347_v32 = vpop.permute.xlu1 %346 }
 0x20f   :  { %v349_v33 = vadd.f32 %v347_v32, %v3259_v22 }
 0x211   :  { %2777 = vtanh.f32 %v349_v33 }
 0x21b   :  { %v3295_v41 = vpop.permute.xlu1 %265 }
 0x21e   :  { %v2778_v38 = vpop.eup %2777 }
 0x21f   :  { %353 = vrot.lane.b32.xlu0 %v2778_v38, %s3085_s4 }
 0x291   :  { %v354_v40 = vpop.permute.xlu0 %353 }
 0x292   :  { %v356_v42 = vmul.f32 %v354_v40, %v351_v39 }
 0x294   :  { %v3298_v43 = vmul.f32 %v356_v42, %v3295_v41 }
 0x296   :  { %v359_v44 = vpack.c.bf16 %v3298_v43, %v3298_v43  ;;  %v591_v60 = vrot.slane %v3298_v43, 6 }
 0x298   :  { %367 = vrot.lane.b32.xlu1 %v359_v44, %s3085_s4 }
 0x30a   :  { %v368_v45 = vpop.permute.xlu1 %367 }
 0x30b   :  { %2541 = vmatmul.mubr.msk.bf16.vlgmr.msra.gmra.mxu1 %vm280_vm3, %v368_v45 }
 0x30c   :  { %2553 = vmatpush3.bf16.msra.mxu1 %v3229_v3  ;;  %2556 = vmatprep.mubr.msk.bf16.mxu1 %vm3083_vm0, %v3082_v0 }
 0x30d   :  { %2554 = vmatprep.subr.bf16.mxu1 %v3082_v0 }
 0x310   :  { %2555 = vmatpush3.bf16.msra.mxu1 %v3233_v5 }
 0x311   :  { %2568 = vmatprep.subr.bf16.mxu1 %v3082_v0 }
 0x313   :  { %2557 = vmatmul.mubr.msk.bf16.vlgmr.msra.gmra.mxu1 %vm280_vm3, %v368_v45 }
 0x314   :  { %2569 = vmatpush3.bf16.msra.mxu1 %v3273_v35  ;;  %2572 = vmatprep.mubr.msk.bf16.mxu1 %vm3083_vm0, %v3082_v0 }
 0x315   :  { %2570 = vmatprep.subr.bf16.mxu1 %v3082_v0 }
 0x318   :  { %2571 = vmatpush3.bf16.msra.mxu1 %v3279_v37 }
 0x319   :  { %2584 = vmatprep.subr.bf16.mxu1 %v3082_v0 }
 0x3cb   :  { %v3319_v50 = vpop.f32.mrf.mxu1 }
 0x3cd   :  { %v2542_v51 = vpop.f32.mrf.mxu1 }
 0x3cf   :  { %v421_v52 = vpop.f32.mrf.mxu1 }
 0x3d1   :  { %v2543_v53 = vpop.f32.mrf.mxu1 }
 0x3d3   :  { %v560_v54 = vpop.f32.mrf.mxu1 }
 0x3d4   :  { %v576_v55 = vadd.f32 %v560_v54, %v3250_v10  ;;  %v567_v61 = vrot.slane %v560_v54, 6 }
 0x3d5   :  { %v2558_v56 = vpop.f32.mrf.mxu1 }
 0x3d6   :  { %v578_v57 = vrot.slane %v576_v55, 6  ;;  %v569_v62 = vadd.f32 %v567_v61, %v3259_v22 }
 0x3d7   :  { %v563_v58 = vpop.f32.mrf.mxu1 }
 0x3d8   :  { %579 = vrot.lane.b32.xlu0 %v578_v57, %s3073_s29  ;;  %v2380_v63 = vmul.f32 -1.442695, %v569_v62  ;;  %v3376_v58 = vld [vmem:[%s3806_s8] ss:$0 sm:$0xff] }
 0x3d9   :  { %v2559_v59 = vpop.f32.mrf.mxu1 }
 0x3da   :  { %2779 = vpow2.f32 %v2380_v63  ;;  %v419_v59 = vadd.f32 %v3376_v58, %v3319_v50 }
 0x3dc   :  { %592 = vrot.lane.b32.xlu0 %v591_v60, %s3086_s21  ;;  %v476_v60 = vadd.f32 %v3317_v46, %v419_v59 }
 0x3de   :  { %v2376_v61 = vmul.f32 -1.442695, %v476_v60 }
 0x3e0   :  { %523 = vperm.xlu0 %2761, %v2378_v8  }
 0x3e7   :  { %v2780_v1 = vpop.eup %2779 }
 0x3e8   :  { %v573_v2 = vadd.f32 1.0, %v2780_v1 }
 0x3ea   :  { %2781 = vrcp.f32 %v573_v2 }
 0x3f7   :  { %v2782_v4 = vpop.eup %2781 }
 0x3f8   :  { %v589_v15 = vsub.f32 1.0, %v2782_v4 }
 0x44a   :  { %v580_v6 = vpop.permute.xlu0 %579 }
 0x44b   :  { %v582_v7 = vmul.f32 %v2782_v4, %v580_v6 }
 0x44d   :  { %584 = vrot.lane.b32.xlu1 %v582_v7, %s3073_s29 }
 0x44e   :  { %v593_v13 = vpop.permute.xlu0 %592 }
 0x45b   :  { %v3332_v19 = vpop.permute.xlu0 %523 }
 0x4bf   :  { %v585_v9 = vpop.permute.xlu1 %584 }
 0x4c0   :  { %v587_v11 = vadd.f32 %v585_v9, %v3259_v22 }
 0x4c2   :  { %2783 = vtanh.f32 %v587_v11 }
 0x4cf   :  { %v2784_v12 = vpop.eup %2783 }
 0x4d0   :  { %v595_v14 = vsub.f32 %v2784_v12, %v593_v13 }
 0x4d2   :  { %597 = vrot.lane.b32.xlu1 %v595_v14, %s3085_s4 }
 0x544   :  { %v598_v16 = vpop.permute.xlu1 %597 }
 0x545   :  { %v600_v17 = vmul.f32 %v598_v16, %v589_v15 }
 0x547   :  { %v602_v18 = vrot.slane %v600_v17, 2 }
 0x549   :  { %603 = vrot.lane.b32.xlu1 %v602_v18, %s3085_s4 }
 0x5bb   :  { %v604_v21 = vpop.permute.xlu1 %603 }
 0x5bc   :  { %v606_v23 = vmul.f32 %v604_v21, %v3332_v19 }
 0x5be   :  { %608 = vrot.lane.b32.xlu1 %v606_v23, %s3086_s21 }
 0x630   :  { %v609_v24 = vpop.permute.xlu1 %608 }
 0x631   :  { %v3337_v25 = vadd.f32 %v609_v24, %v3298_v43 }
 0x633   :  { %v612_v26 = vpack.c.bf16 %v3337_v25, %v3337_v25  ;;  %v817_v29 = vrot.slane %v3337_v25, 4 }
 0x635   :  { %614 = vrot.lane.b32.xlu0 %v612_v26, %s3085_s4 }
 0x639   :  { %488 = vrot.lane.b32.xlu0 %v2377_v28, %s3073_s29 }
 0x63d   :  { %818 = vrot.lane.b32.xlu0 %v817_v29, %s3086_s21 }
 0x6a7   :  { %v615_v30 = vpop.permute.xlu0 %614 }
 0x6a8   :  { %2565 = vmatmul.mubr.msk.bf16.vlgmr.msra.gmra.mxu0 %vm280_vm3, %v615_v30 }
 0x6a9   :  { %2577 = vmatpush3.bf16.msra.mxu0 %v3229_v3  ;;  %2580 = vmatprep.mubr.msk.bf16.mxu0 %vm3083_vm0, %v3082_v0 }
 0x6aa   :  { %2578 = vmatprep.subr.bf16.mxu0 %v3082_v0 }
 0x6ab   :  { %v3368_v56 = vpop.permute.xlu0 %488 }
 0x6ac   :  { %v491_v57 = vadd.f32 %v3368_v56, %v3317_v46  ;;  %v2384_v46 = vsel %vm744_vm5, 1.0, %v3082_v0 }
 0x6ad   :  { %2579 = vmatpush3.bf16.msra.mxu0 %v3233_v5 }
 0x6ae   :  { %2592 = vmatprep.subr.bf16.mxu0 %v3082_v0 }
 0x6af   :  { %v819_v9 = vpop.permute.xlu0 %818 }
 0x6b0   :  { %2581 = vmatmul.mubr.msk.bf16.vlgmr.msra.gmra.mxu0 %vm280_vm3, %v615_v30 }
 0x6b1   :  { %2593 = vmatpush3.bf16.msra.mxu0 %v3273_v35  ;;  %2596 = vmatprep.mubr.msk.bf16.mxu0 %vm3083_vm0, %v3082_v0 }
 0x6b2   :  { %2594 = vmatprep.subr.bf16.mxu0 %v3082_v0 }
 0x6b5   :  { %2595 = vmatpush3.bf16.msra.mxu0 %v3279_v37 }
 0x6b6   :  { %2608 = vmatprep.subr.bf16.mxu0 %v3082_v0 }
 0x768   :  { %v3362_v31 = vpop.f32.mrf.mxu0 }
 0x76a   :  { %v2566_v32 = vpop.f32.mrf.mxu0 }
 0x76c   :  { %v656_v33 = vpop.f32.mrf.mxu0 }
 0x76e   :  { %v2567_v38 = vpop.f32.mrf.mxu0 }
 0x770   :  { %v786_v39 = vpop.f32.mrf.mxu0 }
 0x771   :  { %v802_v40 = vadd.f32 %v786_v39, %v3250_v10  ;;  %v793_v47 = vrot.slane %v786_v39, 4 }
 0x772   :  { %v2582_v42 = vpop.f32.mrf.mxu0 }
 0x773   :  { %v804_v43 = vrot.slane %v802_v40, 4  ;;  %v795_v48 = vadd.f32 %v793_v47, %v3259_v22 }
 0x774   :  { %v789_v44 = vpop.f32.mrf.mxu0 }
 0x775   :  { %805 = vrot.lane.b32.xlu1 %v804_v43, %s3073_s29  ;;  %v2386_v49 = vmul.f32 -1.442695, %v795_v48 }
 0x776   :  { %v2583_v45 = vpop.f32.mrf.mxu0 }
 0x777   :  { %2785 = vpow2.f32 %v2386_v49 }
 0x784   :  { %v2786_v51 = vpop.eup %2785 }
 0x785   :  { %v799_v52 = vadd.f32 1.0, %v2786_v51 }
 0x787   :  { %2787 = vrcp.f32 %v799_v52 }
 0x788   :  { %2789 = vpow2.f32 %v2376_v61 }
 0x794   :  { %v2788_v53 = vpop.eup %2787 }
 0x795   :  { %v2790_v62 = vpop.eup %2789  ;;  %v815_v13 = vsub.f32 1.0, %v2788_v53 }
 0x796   :  { %v480_v63 = vadd.f32 1.0, %v2790_v62 }
 0x798   :  { %2791 = vrcp.f32 %v480_v63  ;;  %v654_v63 = vadd.f32 %v3376_v58, %v3362_v31 }
 0x7a5   :  { %v2792_v4 = vpop.eup %2791 }
 0x7a6   :  { %v503_v21 = vsub.f32 1.0, %v2792_v4 }
 0x7e7   :  { %v806_v54 = vpop.permute.xlu1 %805 }
 0x7e8   :  { %v808_v55 = vmul.f32 %v2788_v53, %v806_v54 }
 0x7ea   :  { %810 = vrot.lane.b32.xlu1 %v808_v55, %s3073_s29 }
 0x7ee   :  { %493 = vrot.lane.b32.xlu1 %v491_v57, %s3073_s29 }
 0x85c   :  { %v811_v1 = vpop.permute.xlu1 %810 }
 0x85d   :  { %v813_v2 = vadd.f32 %v811_v1, %v3259_v22 }
 0x85f   :  { %2793 = vtanh.f32 %v813_v2 }
 0x860   :  { %v494_v6 = vpop.permute.xlu1 %493 }
 0x861   :  { %v496_v7 = vmul.f32 %v2792_v4, %v494_v6 }
 0x863   :  { %498 = vrot.lane.b32.xlu1 %v496_v7, %s3073_s29 }
 0x86c   :  { %v2794_v8 = vpop.eup %2793 }
 0x86d   :  { %v821_v11 = vsub.f32 %v2794_v8, %v819_v9 }
 0x86f   :  { %823 = vrot.lane.b32.xlu0 %v821_v11, %s3085_s4 }
 0x873   :  { %749 = vperm.xlu0 %2761, %v2384_v46  }
 0x8d5   :  { %v499_v50 = vpop.permute.xlu1 %498 }
 0x8d6   :  { %v501_v12 = vadd.f32 %v499_v50, %v419_v59 }
 0x8d8   :  { %2795 = vtanh.f32 %v501_v12 }
 0x8e1   :  { %v824_v14 = vpop.permute.xlu0 %823 }
 0x8e2   :  { %v826_v15 = vmul.f32 %v824_v14, %v815_v13 }
 0x8e4   :  { %v828_v16 = vrot.slane %v826_v15, 4 }
 0x8e5   :  { %v2796_v17 = vpop.eup %2795 }
 0x8e6   :  { %505 = vrot.lane.b32.xlu0 %v2796_v17, %s3085_s4  ;;  %829 = vrot.lane.b32.xlu1 %v828_v16, %s3085_s4 }
 0x8ee   :  { %v3388_v18 = vpop.permute.xlu0 %749 }
 0x958   :  { %v830_v23 = vpop.permute.xlu1 %829  ;;  %v506_v24 = vpop.permute.xlu0 %505 }
 0x959   :  { %v832_v26 = vmul.f32 %v830_v23, %v3388_v18  ;;  %v508_v28 = vmul.f32 %v506_v24, %v503_v21 }
 0x95b   :  { %v3392_v29 = vmul.f32 %v508_v28, %v3295_v41  ;;  %834 = vrot.lane.b32.xlu1 %v832_v26, %s3086_s21 }
 0x95d   :  { %v659_v30 = vpack.c.bf16 %v3392_v29, %v3392_v29 }
 0x95f   :  { %661 = vrot.lane.b32.xlu0 %v659_v30, %s3085_s4  ;;  %v2390_v30 = vsel %vm970_vm6, 1.0, %v3082_v0 }
 0x9cd   :  { %v835_v32 = vpop.permute.xlu1 %834 }
 0x9ce   :  { %v3399_v33 = vadd.f32 %v835_v32, %v3337_v25 }
 0x9d0   :  { %v838_v38 = vpack.c.bf16 %v3399_v33, %v3399_v33  ;;  %v1043_v45 = vrot.slane %v3399_v33, 2 }
 0x9d1   :  { %v662_v39 = vpop.permute.xlu0 %661 }
 0x9d2   :  { %840 = vrot.lane.b32.xlu1 %v838_v38, %s3085_s4  ;;  %2573 = vmatmul.mubr.msk.bf16.vlgmr.msra.gmra.mxu1 %vm280_vm3, %v662_v39 }
 0x9d3   :  { %2585 = vmatpush3.bf16.msra.mxu1 %v3271_v34  ;;  %2588 = vmatprep.mubr.msk.bf16.mxu1 %vm3083_vm0, %v3082_v0 }
 0x9d4   :  { %2586 = vmatprep.subr.bf16.mxu1 %v3082_v0 }
 0x9d7   :  { %2587 = vmatpush3.bf16.msra.mxu1 %v3277_v36 }
 0x9d8   :  { %2600 = vmatprep.subr.bf16.mxu1 %v3082_v0 }
 0xa44   :  { %v841_v25 = vpop.permute.xlu1 %840 }
 0xa45   :  { %2589 = vmatmul.mubr.msk.bf16.vlgmr.msra.gmra.mxu1 %vm280_vm3, %v841_v25 }
 0xa46   :  { %2601 = vmatpush3.bf16.msra.mxu1 %v3229_v3  ;;  %2604 = vmatprep.mubr.msk.bf16.mxu1 %vm3083_vm0, %v3082_v0 }
 0xa47   :  { %2602 = vmatprep.subr.bf16.mxu1 %v3082_v0 }
 0xa4a   :  { %2603 = vmatpush3.bf16.msra.mxu1 %v3233_v5 }
 0xa4b   :  { %2616 = vmatprep.subr.bf16.mxu1 %v3082_v0 }
 0xa4d   :  { %2605 = vmatmul.mubr.msk.bf16.vlgmr.msra.gmra.mxu1 %vm280_vm3, %v841_v25 }
 0xa4e   :  { %2617 = vmatpush3.bf16.msra.mxu1 %v3273_v35  ;;  %2620 = vmatprep.mubr.msk.bf16.mxu1 %vm3083_vm0, %v3082_v0 }
 0xa4f   :  { %2618 = vmatprep.subr.bf16.mxu1 %v3082_v0 }
 0xa52   :  { %2619 = vmatpush3.bf16.msra.mxu1 %v3279_v37 }
 0xa53   :  { %2632 = vmatprep.subr.bf16.mxu1 %v3082_v0 }
 0xa92   :  { %v700_v40 = vpop.f32.mrf.mxu1 }
 0xa93   :  { %v713_v42 = vadd.f32 %v700_v40, %v3368_v56  ;;  %v706_v1 = vadd.f32 %v700_v40, %v654_v63 }
 0xa94   :  { %v2574_v43 = vpop.f32.mrf.mxu1 }
 0xa95   :  { %715 = vrot.lane.b32.xlu1 %v713_v42, %s3073_s29  ;;  %v2383_v4 = vmul.f32 -1.442695, %v706_v1 }
 0xa96   :  { %v703_v44 = vpop.f32.mrf.mxu1 }
 0xa98   :  { %v2575_v47 = vpop.f32.mrf.mxu1 }
 0xa99   :  { %1044 = vrot.lane.b32.xlu1 %v1043_v45, %s3086_s21 }
 0xa9d   :  { %727 = vrot.lane.b32.xlu1 %v3392_v29, %s3086_s21 }
 0xb05   :  { %v3431_v48 = vpop.f32.mrf.mxu1 }
 0xb07   :  { %v2590_v49 = vpop.f32.mrf.mxu1  ;;  %v716_v12 = vpop.permute.xlu1 %715 }
 0xb09   :  { %v882_v51 = vpop.f32.mrf.mxu1 }
 0xb0b   :  { %v2591_v52 = vpop.f32.mrf.mxu1  ;;  %v1045_v21 = vpop.permute.xlu1 %1044 }
 0xb0d   :  { %v1012_v53 = vpop.f32.mrf.mxu1 }
 0xb0e   :  { %v1028_v54 = vadd.f32 %v1012_v53, %v3250_v10  ;;  %v1019_v61 = vrot.slane %v1012_v53, 2 }
 0xb0f   :  { %v2606_v55 = vpop.f32.mrf.mxu1  ;;  %v728_v28 = vpop.permute.xlu1 %727 }
 0xb10   :  { %v1030_v57 = vrot.slane %v1028_v54, 2  ;;  %v1021_v62 = vadd.f32 %v1019_v61, %v3259_v22 }
 0xb11   :  { %v1015_v59 = vpop.f32.mrf.mxu1 }
 0xb12   :  { %1031 = vrot.lane.b32.xlu0 %v1030_v57, %s3073_s29  ;;  %v2392_v2 = vmul.f32 -1.442695, %v1021_v62 }
 0xb13   :  { %v2607_v60 = vpop.f32.mrf.mxu1 }
 0xb14   :  { %2797 = vpow2.f32 %v2392_v2 }
 0xb15   :  { %2799 = vpow2.f32 %v2383_v4 }
 0xb21   :  { %v2798_v6 = vpop.eup %2797 }
 0xb22   :  { %v1025_v7 = vadd.f32 1.0, %v2798_v6  ;;  %v2800_v8 = vpop.eup %2799 }
 0xb23   :  { %v710_v9 = vadd.f32 1.0, %v2800_v8 }
 0xb24   :  { %2801 = vrcp.f32 %v1025_v7 }
 0xb25   :  { %2803 = vrcp.f32 %v710_v9 }
 0xb31   :  { %v2802_v11 = vpop.eup %2801 }
 0xb32   :  { %v2804_v13 = vpop.eup %2803 }
 0xb33   :  { %v718_v14 = vmul.f32 %v2804_v13, %v716_v12  ;;  %v725_v40 = vsub.f32 1.0, %v2804_v13 }
 0xb84   :  { %v1032_v46 = vpop.permute.xlu0 %1031 }
 0xb85   :  { %v1034_v50 = vmul.f32 %v2802_v11, %v1032_v46 }
 0xb87   :  { %1036 = vrot.lane.b32.xlu0 %v1034_v50, %s3073_s29 }
 0xb8b   :  { %720 = vrot.lane.b32.xlu0 %v718_v14, %s3073_s29 }
 0xbf9   :  { %v1037_v31 = vpop.permute.xlu0 %1036 }
 0xbfa   :  { %v1039_v15 = vadd.f32 %v1037_v31, %v3259_v22  ;;  %v1041_v22 = vsub.f32 1.0, %v2802_v11 }
 0xbfc   :  { %2805 = vtanh.f32 %v1039_v15 }
 0xbfd   :  { %v721_v16 = vpop.permute.xlu0 %720 }
 0xbfe   :  { %v723_v17 = vadd.f32 %v721_v16, %v654_v63 }
 0xc00   :  { %2807 = vtanh.f32 %v723_v17 }
 0xc09   :  { %v2806_v23 = vpop.eup %2805 }
 0xc0a   :  { %v1047_v24 = vsub.f32 %v2806_v23, %v1045_v21 }
 0xc0c   :  { %1049 = vrot.lane.b32.xlu0 %v1047_v24, %s3085_s4 }
 0xc0d   :  { %v2808_v26 = vpop.eup %2807 }
 0xc0e   :  { %v730_v32 = vsub.f32 %v2808_v26, %v728_v28  ;;  %v2396_v28 = vsel %vm1196_vm7, 1.0, %v3082_v0 }
 0xc10   :  { %975 = vperm.xlu0 %2761, %v2390_v30   ;;  %732 = vrot.lane.b32.xlu1 %v730_v32, %s3085_s4 }
 0xc7e   :  { %v1050_v38 = vpop.permute.xlu0 %1049 }
 0xc7f   :  { %v1052_v39 = vmul.f32 %v1050_v38, %v1041_v22 }
 0xc81   :  { %v1054_v25 = vrot.slane %v1052_v39, 6 }
 0xc82   :  { %v733_v42 = vpop.permute.xlu1 %732 }
 0xc83   :  { %v735_v43 = vmul.f32 %v733_v42, %v725_v40  ;;  %1055 = vrot.lane.b32.xlu1 %v1054_v25, %s3085_s4 }
 0xc85   :  { %v736_v44 = vmul.f32 %v735_v43, %v3332_v19 }
 0xc87   :  { %v3448_v45 = vadd.f32 %v736_v44, %v3392_v29 }
 0xc89   :  { %v885_v47 = vpack.c.bf16 %v3448_v45, %v3448_v45 }
 0xc8b   :  { %887 = vrot.lane.b32.xlu0 %v885_v47, %s3085_s4  ;;  %v3453_v49 = vpop.permute.xlu0 %975 }
 0xcf5   :  { %v1056_v51 = vpop.permute.xlu1 %1055 }
 0xcf6   :  { %v1058_v52 = vmul.f32 %v1056_v51, %v3453_v49 }
 0xcf8   :  { %1060 = vrot.lane.b32.xlu1 %v1058_v52, %s3086_s21 }
 0xcfd   :  { %v888_v53 = vpop.permute.xlu0 %887 }
 0xcfe   :  { %2597 = vmatmul.mubr.msk.bf16.vlgmr.msra.gmra.mxu0 %vm280_vm3, %v888_v53 }
 0xcff   :  { %2609 = vmatpush3.bf16.msra.mxu0 %v3271_v34  ;;  %2612 = vmatprep.mubr.msk.bf16.mxu0 %vm3083_vm0, %v3082_v0 }
 0xd00   :  { %2610 = vmatprep.subr.bf16.mxu0 %v3082_v0 }
 0xd03   :  { %2611 = vmatpush3.bf16.msra.mxu0 %v3277_v36 }
 0xd04   :  { %2624 = vmatprep.subr.bf16.mxu0 %v3082_v0 }
 0xd6a   :  { %v1061_v54 = vpop.permute.xlu1 %1060 }
 0xd6b   :  { %v3465_v55 = vadd.f32 %v1061_v54, %v3399_v33  ;;  %v880_v33 = vadd.f32 %v3376_v58, %v3431_v48 }
 0xd6d   :  { %v1064_v57 = vpack.c.bf16 %v3465_v55, %v3465_v55 }
 0xd6f   :  { %1066 = vrot.lane.b32.xlu0 %v1064_v57, %s3085_s4 }
 0xdbe   :  { %v926_v59 = vpop.f32.mrf.mxu0 }
 0xdbf   :  { %v939_v60 = vadd.f32 %v926_v59, %v3368_v56  ;;  %v932_v2 = vadd.f32 %v926_v59, %v880_v33 }
 0xdc0   :  { %v2598_v61 = vpop.f32.mrf.mxu0 }
 0xdc1   :  { %941 = vrot.lane.b32.xlu1 %v939_v60, %s3073_s29  ;;  %v2389_v4 = vmul.f32 -1.442695, %v932_v2 }
 0xdc2   :  { %v929_v62 = vpop.f32.mrf.mxu0 }
 0xdc3   :  { %2809 = vpow2.f32 %v2389_v4 }
 0xdc4   :  { %v2599_v63 = vpop.f32.mrf.mxu0 }
 0xdc5   :  { %953 = vrot.lane.b32.xlu1 %v3448_v45, %s3086_s21 }
 0xdd0   :  { %v2810_v6 = vpop.eup %2809 }
 0xdd1   :  { %v936_v7 = vadd.f32 1.0, %v2810_v6 }
 0xdd3   :  { %2811 = vrcp.f32 %v936_v7 }
 0xde0   :  { %v2812_v8 = vpop.eup %2811 }
 0xde1   :  { %v1067_v1 = vpop.permute.xlu0 %1066  ;;  %v951_v42 = vsub.f32 1.0, %v2812_v8 }
 0xde2   :  { %2613 = vmatmul.mubr.msk.bf16.vlgmr.msra.gmra.mxu0 %vm280_vm3, %v1067_v1 }
 0xde3   :  { %2625 = vmatpush3.bf16.msra.mxu0 %v3229_v3  ;;  %2628 = vmatprep.mubr.msk.bf16.mxu0 %vm3083_vm0, %v3082_v0 }
 0xde4   :  { %2626 = vmatprep.subr.bf16.mxu0 %v3082_v0 }
 0xde7   :  { %2627 = vmatpush3.bf16.msra.mxu0 %v3233_v5 }
 0xde8   :  { %2640 = vmatprep.subr.bf16.mxu0 %v3082_v0 }
 0xdea   :  { %2629 = vmatmul.mubr.msk.bf16.vlgmr.msra.gmra.mxu0 %vm280_vm3, %v1067_v1 }
 0xdeb   :  { %2641 = vmatpush3.bf16.msra.mxu0 %v3273_v35  ;;  %2644 = vmatprep.mubr.msk.bf16.mxu0 %vm3083_vm0, %v3082_v0 }
 0xdec   :  { %2642 = vmatprep.subr.bf16.mxu0 %v3082_v0 }
 0xdef   :  { %2643 = vmatpush3.bf16.msra.mxu0 %v3279_v37 }
 0xdf0   :  { %2656 = vmatprep.subr.bf16.mxu0 %v3082_v0 }
 0xe33   :  { %v942_v9 = vpop.permute.xlu1 %941 }
 0xe34   :  { %v944_v11 = vmul.f32 %v2812_v8, %v942_v9 }
 0xe36   :  { %946 = vrot.lane.b32.xlu0 %v944_v11, %s3073_s29 }
 0xe37   :  { %v954_v24 = vpop.permute.xlu1 %953 }
 0xea2   :  { %v3491_v46 = vpop.f32.mrf.mxu0 }
 0xea4   :  { %v2614_v50 = vpop.f32.mrf.mxu0 }
 0xea6   :  { %v1108_v12 = vpop.f32.mrf.mxu0 }
 0xea8   :  { %v2615_v13 = vpop.f32.mrf.mxu0  ;;  %v947_v14 = vpop.permute.xlu0 %946 }
 0xea9   :  { %v949_v31 = vadd.f32 %v947_v14, %v880_v33 }
 0xeaa   :  { %v1238_v15 = vpop.f32.mrf.mxu0 }
 0xeab   :  { %2813 = vtanh.f32 %v949_v31  ;;  %v1251_v48 = vadd.f32 %v1238_v15, %v3250_v10  ;;  %v1244_v30 = vadd.f32 %v1238_v15, %v3257_v20 }
 0xeac   :  { %v2630_v16 = vpop.f32.mrf.mxu0 }
 0xead   :  { %1253 = vrot.lane.b32.xlu0 %v1251_v48, %s3073_s29  ;;  %v2398_v32 = vmul.f32 -1.442695, %v1244_v30 }
 0xeae   :  { %v1241_v17 = vpop.f32.mrf.mxu0 }
 0xeaf   :  { %2815 = vpow2.f32 %v2398_v32 }
 0xeb0   :  { %v2631_v21 = vpop.f32.mrf.mxu0 }
 0xeb8   :  { %v2814_v23 = vpop.eup %2813 }
 0xeb9   :  { %v956_v26 = vsub.f32 %v2814_v23, %v954_v24 }
 0xebb   :  { %958 = vrot.lane.b32.xlu1 %v956_v26, %s3085_s4 }
 0xebc   :  { %v2816_v22 = vpop.eup %2815 }
 0xebd   :  { %v1248_v38 = vadd.f32 1.0, %v2816_v22 }
 0xebf   :  { %1265 = vrot.lane.b32.xlu1 %v3465_v55, %s3086_s21  ;;  %2817 = vrcp.f32 %v1248_v38 }
 0xec3   :  { %1201 = vperm.xlu1 %2760, %v2396_v28  }
 0xecc   :  { %v2818_v39 = vpop.eup %2817 }
 0xecd   :  { %v1263_v62 = vsub.f32 1.0, %v2818_v39 }
 0xf1f   :  { %v1254_v25 = vpop.permute.xlu0 %1253 }
 0xf20   :  { %v1256_v40 = vmul.f32 %v2818_v39, %v1254_v25 }
 0xf22   :  { %1258 = vrot.lane.b32.xlu0 %v1256_v40, %s3073_s29 }
 0xf2d   :  { %v959_v43 = vpop.permute.xlu1 %958 }
 0xf2e   :  { %v961_v44 = vmul.f32 %v959_v43, %v951_v42 }
 0xf30   :  { %v962_v47 = vmul.f32 %v961_v44, %v3388_v18 }
 0xf31   :  { %v1266_v59 = vpop.permute.xlu1 %1265 }
 0xf32   :  { %v3504_v51 = vadd.f32 %v962_v47, %v3448_v45 }
 0xf34   :  { %v1111_v52 = vpack.c.bf16 %v3504_v51, %v3504_v51 }
 0xf36   :  { %1113 = vrot.lane.b32.xlu0 %v1111_v52, %s3085_s4 }
 0xf3e   :  { %v3518_v33 = vpop.permute.xlu1 %1201 }
 0xf94   :  { %v1259_v53 = vpop.permute.xlu0 %1258 }
 0xf95   :  { %v1261_v54 = vadd.f32 %v1259_v53, %v3257_v20 }
 0xf97   :  { %2819 = vtanh.f32 %v1261_v54 }
 0xfa4   :  { %v2820_v57 = vpop.eup %2819 }
 0xfa5   :  { %v1268_v60 = vsub.f32 %v2820_v57, %v1266_v59 }
 0xfa7   :  { %1270 = vrot.lane.b32.xlu0 %v1268_v60, %s3085_s4 }
 0xfa8   :  { %v1114_v61 = vpop.permute.xlu0 %1113 }
 0xfa9   :  { %2621 = vmatmul.mubr.msk.bf16.vlgmr.msra.gmra.mxu1 %vm280_vm3, %v1114_v61 }
 0xfaa   :  { %2633 = vmatpush3.bf16.msra.mxu1 %v3271_v34  ;;  %2636 = vmatprep.mubr.msk.bf16.mxu1 %vm3083_vm0, %v3082_v0 }
 0xfab   :  { %2634 = vmatprep.subr.bf16.mxu1 %v3082_v0 }
 0xfae   :  { %2635 = vmatpush3.bf16.msra.mxu1 %v3277_v36 }
 0xfaf   :  { %2648 = vmatprep.subr.bf16.mxu1 %v3082_v0 }
0x1019   :  { %v1271_v63 = vpop.permute.xlu0 %1270 }
0x101a   :  { %v1273_v1 = vmul.f32 %v1271_v63, %v1263_v62 }
0x101c   :  { %v1274_v2 = vmul.f32 %v1273_v1, %v3518_v33 }
0x101e   :  { %v3522_v4 = vadd.f32 %v1274_v2, %v3465_v55 }
0x1020   :  { %v1276_v6 = vpack.c.bf16 %v3522_v4, %v3522_v4  ;;  %v1481_v42 = vrot.slane %v3522_v4, 6 }
0x1022   :  { %1278 = vrot.lane.b32.xlu1 %v1276_v6, %s3085_s4  ;;  %v2402_v6 = vsel %vm1408_vm8, 1.0, %v3082_v0 }
0x1069   :  { %v1152_v7 = vpop.f32.mrf.mxu1 }
0x106a   :  { %v1165_v8 = vadd.f32 %v1152_v7, %v3368_v56 }
0x106b   :  { %v2622_v9 = vpop.f32.mrf.mxu1 }
0x106c   :  { %1167 = vrot.lane.b32.xlu0 %v1165_v8, %s3073_s29 }
0x106d   :  { %v1155_v11 = vpop.f32.mrf.mxu1 }
0x106f   :  { %v2623_v50 = vpop.f32.mrf.mxu1 }
0x1070   :  { %1179 = vrot.lane.b32.xlu0 %v3504_v51, %s3086_s21 }
0x1094   :  { %v1279_v12 = vpop.permute.xlu1 %1278 }
0x1095   :  { %2637 = vmatmul.mubr.msk.bf16.vlgmr.msra.gmra.mxu1 %vm280_vm3, %v1279_v12 }
0x1096   :  { %2649 = vmatpush3.bf16.msra.mxu1 %v3229_v3  ;;  %2652 = vmatprep.mubr.msk.bf16.mxu1 %vm3083_vm0, %v3082_v0  ;;  %v1106_v3 = vadd.f32 %v3376_v58, %v3491_v46 }
0x1097   :  { %2650 = vmatprep.subr.bf16.mxu1 %v3082_v0 }
0x1098   :  { %v1158_v55 = vadd.f32 %v1152_v7, %v1106_v3 }
0x109a   :  { %2651 = vmatpush3.bf16.msra.mxu1 %v3233_v5  ;;  %v2395_v5 = vmul.f32 -1.442695, %v1158_v55 }
0x109b   :  { %2664 = vmatprep.subr.bf16.mxu1 %v3082_v0 }
0x109c   :  { %2821 = vpow2.f32 %v2395_v5 }
0x109d   :  { %2653 = vmatmul.mubr.msk.bf16.vlgmr.msra.gmra.mxu1 %vm280_vm3, %v1279_v12 }
0x109e   :  { %2665 = vmatpush3.bf16.msra.mxu1 %v3273_v35  ;;  %2668 = vmatprep.mubr.msk.bf16.mxu1 %vm3083_vm0, %v3082_v0 }
0x109f   :  { %2666 = vmatprep.subr.bf16.mxu1 %v3082_v0 }
0x10a2   :  { %2667 = vmatpush3.bf16.msra.mxu1 %v3279_v37 }
0x10a3   :  { %2680 = vmatprep.subr.bf16.mxu1 %v3082_v0 }
0x10a9   :  { %v2822_v13 = vpop.eup %2821 }
0x10aa   :  { %v1162_v14 = vadd.f32 1.0, %v2822_v13 }
0x10ac   :  { %2823 = vrcp.f32 %v1162_v14 }
0x10b9   :  { %v2824_v31 = vpop.eup %2823 }
0x10ba   :  { %v1177_v60 = vsub.f32 1.0, %v2824_v31 }
0x10de   :  { %v1168_v15 = vpop.permute.xlu0 %1167 }
0x10df   :  { %v1170_v48 = vmul.f32 %v2824_v31, %v1168_v15 }
0x10e1   :  { %1172 = vrot.lane.b32.xlu1 %v1170_v48, %s3073_s29 }
0x10e2   :  { %v1180_v39 = vpop.permute.xlu0 %1179 }
0x1153   :  { %v1173_v16 = vpop.permute.xlu1 %1172 }
0x1154   :  { %v1175_v17 = vadd.f32 %v1173_v16, %v1106_v3 }
0x1155   :  { %v3548_v21 = vpop.f32.mrf.mxu1 }
0x1156   :  { %2825 = vtanh.f32 %v1175_v17  ;;  %v1318_v17 = vadd.f32 %v3376_v58, %v3548_v21 }
0x1157   :  { %v2638_v23 = vpop.f32.mrf.mxu1 }
0x1159   :  { %v1320_v24 = vpop.f32.mrf.mxu1 }
0x115b   :  { %v2639_v26 = vpop.f32.mrf.mxu1 }
0x115d   :  { %v1450_v46 = vpop.f32.mrf.mxu1 }
0x115e   :  { %v1466_v28 = vadd.f32 %v1450_v46, %v3250_v10  ;;  %v1457_v43 = vrot.slane %v1450_v46, 6 }
0x115f   :  { %v2654_v30 = vpop.f32.mrf.mxu1 }
0x1160   :  { %v1468_v32 = vrot.slane %v1466_v28, 6  ;;  %v1459_v44 = vadd.f32 %v1457_v43, %v3257_v20 }
0x1161   :  { %v1453_v22 = vpop.f32.mrf.mxu1 }
0x1162   :  { %1469 = vrot.lane.b32.xlu1 %v1468_v32, %s3073_s29  ;;  %v2404_v47 = vmul.f32 -1.442695, %v1459_v44 }
0x1163   :  { %v2826_v38 = vpop.eup %2825  ;;  %v2655_v25 = vpop.f32.mrf.mxu1 }
0x1164   :  { %v1182_v40 = vsub.f32 %v2826_v38, %v1180_v39  ;;  %2827 = vpow2.f32 %v2404_v47  ;;  %v3594_v25 = vld [vmem:[#allocation8 + $0x8] sm:$0xff]  }
0x1166   :  { %1184 = vrot.lane.b32.xlu0 %v1182_v40, %s3085_s4 }
0x116a   :  { %1482 = vrot.lane.b32.xlu0 %v1481_v42, %s3086_s21  ;;  %v3600_v42 = vld [vmem:[#allocation8] sm:$0xff]  }
0x1171   :  { %v2828_v52 = vpop.eup %2827 }
0x1172   :  { %v1463_v53 = vadd.f32 1.0, %v2828_v52 }
0x1174   :  { %2829 = vrcp.f32 %v1463_v53 }
0x1181   :  { %v2830_v54 = vpop.eup %2829 }
0x1182   :  { %v1479_v12 = vsub.f32 1.0, %v2830_v54 }
0x11d4   :  { %v1470_v57 = vpop.permute.xlu1 %1469 }
0x11d5   :  { %v1472_v59 = vmul.f32 %v2830_v54, %v1470_v57 }
0x11d7   :  { %1474 = vrot.lane.b32.xlu1 %v1472_v59, %s3073_s29 }
0x11d8   :  { %v1185_v61 = vpop.permute.xlu0 %1184 }
0x11d9   :  { %v1187_v62 = vmul.f32 %v1185_v61, %v1177_v60 }
0x11db   :  { %v1188_v63 = vmul.f32 %v1187_v62, %v3453_v49 }
0x11dc   :  { %v1483_v11 = vpop.permute.xlu0 %1482 }
0x11dd   :  { %v3559_v1 = vadd.f32 %v1188_v63, %v3504_v51 }
0x11df   :  { %v1323_v2 = vpack.c.bf16 %v3559_v1, %v3559_v1 }
0x11e1   :  { %1325 = vrot.lane.b32.xlu1 %v1323_v2, %s3085_s4 }
0x11e5   :  { %1413 = vperm.xlu1 %2760, %v2402_v6  }
0x1249   :  { %v1475_v7 = vpop.permute.xlu1 %1474 }
0x124a   :  { %v1477_v8 = vadd.f32 %v1475_v7, %v3257_v20 }
0x124c   :  { %2831 = vtanh.f32 %v1477_v8 }
0x1253   :  { %v1326_v9 = vpop.permute.xlu1 %1325 }
0x1254   :  { %2645 = vmatmul.mubr.msk.bf16.vlgmr.msra.gmra.mxu0 %vm280_vm3, %v1326_v9 }
0x1255   :  { %2657 = vmatpush3.bf16.msra.mxu0 %v3271_v34  ;;  %2660 = vmatprep.mubr.msk.bf16.mxu0 %vm3083_vm0, %v3082_v0 }
0x1256   :  { %2658 = vmatprep.subr.bf16.mxu0 %v3082_v0 }
0x1259   :  { %v2832_v27 = vpop.eup %2831  ;;  %2659 = vmatpush3.bf16.msra.mxu0 %v3277_v36 }
0x125a   :  { %v1485_v50 = vsub.f32 %v2832_v27, %v1483_v11  ;;  %2672 = vmatprep.subr.bf16.mxu0 %v3082_v0  ;;  %v3625_v11 = vld [vmem:[%s3820_s10] sm:$0x3] }
0x125b   :  { %vm1634_vm9 = vcmp.gt.s32.totalorder %v3625_v11, 6  ;;  %vm1860_vm10 = vcmp.gt.s32.totalorder %v3625_v11, 7 }
0x125c   :  { %1487 = vrot.lane.b32.xlu0 %v1485_v50, %s3085_s4  ;;  %v2408_v50 = vsel %vm1634_vm9, 1.0, %v3082_v0 }
0x1260   :  { %v3576_v15 = vpop.permute.xlu1 %1413 }
0x12ce   :  { %v1488_v3 = vpop.permute.xlu0 %1487 }
0x12cf   :  { %v1490_v55 = vmul.f32 %v1488_v3, %v1479_v12  ;;  %v3631_v3 = vld [vmem:[#allocation9 + $0x8] sm:$0xff]  }
0x12d1   :  { %v1492_v5 = vrot.slane %v1490_v55, 2  ;;  %v3637_v55 = vld [vmem:[#allocation9] sm:$0xff]  }
0x12d3   :  { %1493 = vrot.lane.b32.xlu0 %v1492_v5, %s3085_s4 }
0x1314   :  { %v1364_v34 = vpop.f32.mrf.mxu0 }
0x1315   :  { %v1377_v16 = vadd.f32 %v1364_v34, %v3368_v56  ;;  %v1370_v23 = vadd.f32 %v1364_v34, %v1318_v17 }
0x1316   :  { %v2646_v13 = vpop.f32.mrf.mxu0 }
0x1317   :  { %v2401_v24 = vmul.f32 -1.442695, %v1370_v23 }
0x1318   :  { %v1367_v14 = vpop.f32.mrf.mxu0 }
0x1319   :  { %2833 = vpow2.f32 %v2401_v24 }
0x131a   :  { %v2647_v31 = vpop.f32.mrf.mxu0 }
0x1326   :  { %v2834_v26 = vpop.eup %2833 }
0x1327   :  { %v1374_v46 = vadd.f32 1.0, %v2834_v26 }
0x1329   :  { %2835 = vrcp.f32 %v1374_v46 }
0x1336   :  { %v2836_v38 = vpop.eup %2835 }
0x1337   :  { %v1389_v52 = vsub.f32 1.0, %v2836_v38 }
0x1345   :  { %v1494_v48 = vpop.permute.xlu0 %1493 }
0x1346   :  { %v1496_v36 = vmul.f32 %v1494_v48, %v3576_v15 }
0x1348   :  { %1498 = vrot.lane.b32.xlu1 %v1496_v36, %s3086_s21 }
0x134c   :  { %1379 = vrot.lane.b32.xlu1 %v1377_v16, %s3073_s29 }
0x1350   :  { %1391 = vrot.lane.b32.xlu1 %v3559_v1, %s3086_s21 }
0x13ba   :  { %v1499_v28 = vpop.permute.xlu1 %1498 }
0x13bb   :  { %v3587_v30 = vadd.f32 %v1499_v28, %v3522_v4 }
0x13bd   :  { %v1502_v32 = vpack.c.bf16 %v3587_v30, %v3587_v30  ;;  %v1707_v27 = vrot.slane %v3587_v30, 4 }
0x13be   :  { %v1380_v22 = vpop.permute.xlu1 %1379 }
0x13bf   :  { %1504 = vrot.lane.b32.xlu0 %v1502_v32, %s3085_s4  ;;  %v1382_v39 = vmul.f32 %v2836_v38, %v1380_v22 }
0x13c2   :  { %v1392_v44 = vpop.permute.xlu1 %1391 }
0x13c3   :  { %1384 = vrot.lane.b32.xlu0 %v1382_v39, %s3073_s29 }
0x1431   :  { %v1505_v21 = vpop.permute.xlu0 %1504 }
0x1432   :  { %2661 = vmatmul.mubr.msk.bf16.vlgmr.msra.gmra.mxu0 %vm280_vm3, %v1505_v21 }
0x1433   :  { %2673 = vmatpush3.bf16.msra.mxu0 %v3594_v25  ;;  %2676 = vmatprep.mubr.msk.bf16.mxu0 %vm3083_vm0, %v3082_v0 }
0x1434   :  { %2674 = vmatprep.subr.bf16.mxu0 %v3082_v0 }
0x1435   :  { %v1385_v4 = vpop.permute.xlu0 %1384 }
0x1436   :  { %v1387_v40 = vadd.f32 %v1385_v4, %v1318_v17 }
0x1437   :  { %2675 = vmatpush3.bf16.msra.mxu0 %v3600_v42 }
0x1438   :  { %2837 = vtanh.f32 %v1387_v40  ;;  %2688 = vmatprep.subr.bf16.mxu0 %v3082_v0 }
0x143a   :  { %2677 = vmatmul.mubr.msk.bf16.vlgmr.msra.gmra.mxu0 %vm280_vm3, %v1505_v21 }
0x143b   :  { %2689 = vmatpush3.bf16.msra.mxu0 %v3273_v35  ;;  %2692 = vmatprep.mubr.msk.bf16.mxu0 %vm3083_vm0, %v3082_v0 }
0x143c   :  { %2690 = vmatprep.subr.bf16.mxu0 %v3082_v0 }
0x143f   :  { %2691 = vmatpush3.bf16.msra.mxu0 %v3279_v37 }
0x1440   :  { %2704 = vmatprep.subr.bf16.mxu0 %v3082_v0 }
0x1445   :  { %v2838_v43 = vpop.eup %2837 }
0x1446   :  { %v1394_v47 = vsub.f32 %v2838_v43, %v1392_v44 }
0x1448   :  { %1396 = vrot.lane.b32.xlu0 %v1394_v47, %s3085_s4 }
0x14ba   :  { %v1397_v53 = vpop.permute.xlu0 %1396 }
0x14bb   :  { %v1399_v54 = vmul.f32 %v1397_v53, %v1389_v52 }
0x14bd   :  { %v1400_v57 = vmul.f32 %v1399_v54, %v3518_v33 }
0x14bf   :  { %v3614_v35 = vadd.f32 %v1400_v57, %v3559_v1 }
0x14c1   :  { %v1549_v59 = vpack.c.bf16 %v3614_v35, %v3614_v35 }
0x14c3   :  { %1551 = vrot.lane.b32.xlu1 %v1549_v59, %s3085_s4 }
0x14f2   :  { %v1543_v37 = vpop.f32.mrf.mxu0 }
0x14f3   :  { %v1544_v21 = vadd.f32 %v3376_v58, %v1543_v37 }
0x14f4   :  { %v2662_v60 = vpop.f32.mrf.mxu0 }
0x14f6   :  { %v1546_v61 = vpop.f32.mrf.mxu0 }
0x14f8   :  { %v2663_v62 = vpop.f32.mrf.mxu0 }
0x14fa   :  { %v1676_v63 = vpop.f32.mrf.mxu0 }
0x14fb   :  { %v1692_v2 = vadd.f32 %v1676_v63, %v3250_v10  ;;  %v1683_v5 = vrot.slane %v1676_v63, 4 }
0x14fc   :  { %v2678_v6 = vpop.f32.mrf.mxu0 }
0x14fd   :  { %v1694_v7 = vrot.slane %v1692_v2, 4  ;;  %v1685_v34 = vadd.f32 %v1683_v5, %v3257_v20 }
0x14fe   :  { %v1679_v8 = vpop.f32.mrf.mxu0 }
0x14ff   :  { %1695 = vrot.lane.b32.xlu0 %v1694_v7, %s3073_s29  ;;  %v2410_v13 = vmul.f32 -1.442695, %v1685_v34 }
0x1500   :  { %v2679_v9 = vpop.f32.mrf.mxu0 }
0x1501   :  { %2839 = vpow2.f32 %v2410_v13 }
0x1503   :  { %1708 = vrot.lane.b32.xlu0 %v1707_v27, %s3086_s21 }
0x1507   :  { %1639 = vperm.xlu0 %2761, %v2408_v50  }
0x150e   :  { %v2840_v14 = vpop.eup %2839 }
0x150f   :  { %v1689_v31 = vadd.f32 1.0, %v2840_v14  ;;  %v2876_v14 = vld [vmem:[#allocation11 + $0x8] sm:$0xff]  }
0x1511   :  { %2841 = vrcp.f32 %v1689_v31 }
0x151e   :  { %v2842_v48 = vpop.eup %2841 }
0x151f   :  { %v1705_v52 = vsub.f32 1.0, %v2842_v48 }
0x1535   :  { %v1552_v12 = vpop.permute.xlu1 %1551 }
0x1536   :  { %2669 = vmatmul.mubr.msk.bf16.vlgmr.msra.gmra.mxu1 %vm280_vm3, %v1552_v12 }
0x1537   :  { %2681 = vmatpush3.bf16.msra.mxu1 %v3631_v3  ;;  %2684 = vmatprep.mubr.msk.bf16.mxu1 %vm3083_vm0, %v3082_v0 }
0x1538   :  { %2682 = vmatprep.subr.bf16.mxu1 %v3082_v0 }
0x153b   :  { %2683 = vmatpush3.bf16.msra.mxu1 %v3637_v55 }
0x153c   :  { %2696 = vmatprep.subr.bf16.mxu1 %v3082_v0 }
0x1571   :  { %v1696_v36 = vpop.permute.xlu0 %1695 }
0x1572   :  { %v1698_v16 = vmul.f32 %v2842_v48, %v1696_v36 }
0x1574   :  { %1700 = vrot.lane.b32.xlu1 %v1698_v16, %s3073_s29 }
0x1575   :  { %v1709_v26 = vpop.permute.xlu0 %1708 }
0x1582   :  { %v3648_v47 = vpop.permute.xlu0 %1639 }
0x15e6   :  { %v1701_v17 = vpop.permute.xlu1 %1700 }
0x15e7   :  { %v1703_v23 = vadd.f32 %v1701_v17, %v3257_v20 }
0x15e9   :  { %2843 = vtanh.f32 %v1703_v23 }
0x15f6   :  { %v2844_v24 = vpop.eup %2843  ;;  %v1590_v46 = vpop.f32.mrf.mxu1 }
0x15f7   :  { %v1711_v28 = vsub.f32 %v2844_v24, %v1709_v26  ;;  %v1603_v32 = vadd.f32 %v1590_v46, %v3368_v56  ;;  %v1596_v4 = vadd.f32 %v1590_v46, %v1544_v21 }
0x15f8   :  { %v2670_v22 = vpop.f32.mrf.mxu1 }
0x15f9   :  { %1713 = vrot.lane.b32.xlu1 %v1711_v28, %s3085_s4  ;;  %1605 = vrot.lane.b32.xlu0 %v1603_v32, %s3073_s29  ;;  %v2407_v40 = vmul.f32 -1.442695, %v1596_v4 }
0x15fa   :  { %v1593_v38 = vpop.f32.mrf.mxu1 }
0x15fb   :  { %2845 = vpow2.f32 %v2407_v40 }
0x15fc   :  { %v2671_v39 = vpop.f32.mrf.mxu1 }
0x1608   :  { %v2846_v43 = vpop.eup %2845 }
0x1609   :  { %v1600_v44 = vadd.f32 1.0, %v2846_v43 }
0x160b   :  { %2847 = vrcp.f32 %v1600_v44 }
0x1618   :  { %v2848_v53 = vpop.eup %2847 }
0x1619   :  { %v1615_v12 = vsub.f32 1.0, %v2848_v53 }
0x166b   :  { %v1714_v54 = vpop.permute.xlu1 %1713  ;;  %v1606_v57 = vpop.permute.xlu0 %1605 }
0x166c   :  { %v1716_v59 = vmul.f32 %v1714_v54, %v1705_v52  ;;  %v1608_v60 = vmul.f32 %v2848_v53, %v1606_v57  ;;  %v3698_v57 = vld [vmem:[%s3806_s8] ss:$0 sm:$0xff] }
0x166e   :  { %v1718_v61 = vrot.slane %v1716_v59, 4  ;;  %1610 = vrot.lane.b32.xlu0 %v1608_v60, %s3073_s29 }
0x1670   :  { %1719 = vrot.lane.b32.xlu1 %v1718_v61, %s3085_s4 }
0x16e0   :  { %v1611_v62 = vpop.permute.xlu0 %1610 }
0x16e1   :  { %v1613_v63 = vadd.f32 %v1611_v62, %v1544_v21 }
0x16e2   :  { %v1720_v58 = vpop.permute.xlu1 %1719 }
0x16e3   :  { %v1722_v37 = vmul.f32 %v1720_v58, %v3648_v47  ;;  %2849 = vtanh.f32 %v1613_v63 }
0x16e5   :  { %1724 = vrot.lane.b32.xlu1 %v1722_v37, %s3086_s21 }
0x16e9   :  { %1617 = vrot.lane.b32.xlu1 %v3614_v35, %s3086_s21 }
0x16f0   :  { %v2850_v8 = vpop.eup %2849 }
0x1757   :  { %v1725_v2 = vpop.permute.xlu1 %1724 }
0x1758   :  { %v3657_v6 = vadd.f32 %v1725_v2, %v3587_v30 }
0x175a   :  { %v1728_v7 = vpack.c.bf16 %v3657_v6, %v3657_v6  ;;  %v1933_v32 = vrot.slane %v3657_v6, 2 }
0x175b   :  { %v1618_v9 = vpop.permute.xlu1 %1617 }
0x175c   :  { %v1620_v27 = vsub.f32 %v2850_v8, %v1618_v9  ;;  %1730 = vrot.lane.b32.xlu0 %v1728_v7, %s3085_s4  ;;  %v2414_v9 = vsel %vm1860_vm10, 1.0, %v3082_v0 }
0x175e   :  { %1622 = vrot.lane.b32.xlu1 %v1620_v27, %s3085_s4 }
0x17ce   :  { %v1731_v50 = vpop.permute.xlu0 %1730 }
0x17cf   :  { %2685 = vmatmul.mubr.msk.bf16.vlgmr.msra.gmra.mxu1 %vm280_vm3, %v1731_v50 }
0x17d0   :  { %2697 = vmatpush3.bf16.msra.mxu1 %v3594_v25  ;;  %v1623_v5 = vpop.permute.xlu1 %1622  ;;  %2700 = vmatprep.mubr.msk.bf16.mxu1 %vm3083_vm0, %v3082_v0 }
0x17d1   :  { %v1625_v30 = vmul.f32 %v1623_v5, %v1615_v12  ;;  %2698 = vmatprep.subr.bf16.mxu1 %v3082_v0 }
0x17d3   :  { %v1626_v34 = vmul.f32 %v1625_v30, %v3576_v15 }
0x17d4   :  { %2699 = vmatpush3.bf16.msra.mxu1 %v3600_v42  ;;  %v2877_v42 = vld [vmem:[#allocation11] sm:$0xff]  }
0x17d5   :  { %v3671_v13 = vadd.f32 %v1626_v34, %v3614_v35  ;;  %2712 = vmatprep.subr.bf16.mxu1 %v3082_v0 }
0x17d7   :  { %2701 = vmatmul.mubr.msk.bf16.vlgmr.msra.gmra.mxu1 %vm280_vm3, %v1731_v50  ;;  %v1775_v25 = vpack.c.bf16 %v3671_v13, %v3671_v13 }
0x17d8   :  { %2713 = vmatpush3.bf16.msra.mxu1 %v2876_v14  ;;  %2716 = vmatprep.mubr.msk.bf16.mxu1 %vm3083_vm0, %v3082_v0 }
0x17d9   :  { %1777 = vrot.lane.b32.xlu0 %v1775_v25, %s3085_s4  ;;  %2714 = vmatprep.subr.bf16.mxu1 %v3082_v0 }
0x17dc   :  { %2715 = vmatpush3.bf16.msra.mxu1 %v2877_v42 }
0x184b   :  { %v1778_v31 = vpop.permute.xlu0 %1777 }
0x184c   :  { %2693 = vmatmul.mubr.msk.bf16.vlgmr.msra.gmra.mxu0 %vm280_vm3, %v1778_v31 }
0x184d   :  { %2705 = vmatpush3.bf16.msra.mxu0 %v3631_v3  ;;  %2708 = vmatprep.mubr.msk.bf16.mxu0 %vm3083_vm0, %v3082_v0 }
0x184e   :  { %2706 = vmatprep.subr.bf16.mxu0 %v3082_v0 }
0x1851   :  { %2707 = vmatpush3.bf16.msra.mxu0 %v3637_v55 }
0x188f   :  { %v1769_v48 = vpop.f32.mrf.mxu1 }
0x1890   :  { %v1770_v59 = vadd.f32 %v3698_v57, %v1769_v48 }
0x1891   :  { %v2686_v36 = vpop.f32.mrf.mxu1 }
0x1893   :  { %v1772_v16 = vpop.f32.mrf.mxu1 }
0x1895   :  { %v2687_v17 = vpop.f32.mrf.mxu1 }
0x1897   :  { %v1902_v23 = vpop.f32.mrf.mxu1 }
0x1898   :  { %v1918_v24 = vadd.f32 %v1902_v23, %v3250_v10  ;;  %v1909_v22 = vrot.slane %v1902_v23, 2 }
0x1899   :  { %v2702_v26 = vpop.f32.mrf.mxu1 }
0x189a   :  { %v1920_v46 = vrot.slane %v1918_v24, 2  ;;  %v1911_v55 = vadd.f32 %v1909_v22, %v3257_v20 }
0x189b   :  { %v1905_v28 = vpop.f32.mrf.mxu1 }
0x189c   :  { %1921 = vrot.lane.b32.xlu1 %v1920_v46, %s3073_s29  ;;  %v2416_v38 = vmul.f32 -1.442695, %v1911_v55 }
0x189d   :  { %v2703_v3 = vpop.f32.mrf.mxu1 }
0x189e   :  { %2851 = vpow2.f32 %v2416_v38 }
0x18a0   :  { %1934 = vrot.lane.b32.xlu1 %v1933_v32, %s3086_s21 }
0x18ab   :  { %v2852_v39 = vpop.eup %2851 }
0x18ac   :  { %v1915_v21 = vadd.f32 1.0, %v2852_v39 }
0x18ae   :  { %2853 = vrcp.f32 %v1915_v21 }
0x18bb   :  { %v2854_v10 = vpop.eup %2853 }
0x18bc   :  { %v1931_v30 = vsub.f32 1.0, %v2854_v10 }
0x190c   :  { %v1816_v4 = vpop.f32.mrf.mxu0 }
0x190d   :  { %v1829_v54 = vadd.f32 %v1816_v4, %v3368_v56  ;;  %v1822_v60 = vadd.f32 %v1816_v4, %v1770_v59 }
0x190e   :  { %v2694_v40 = vpop.f32.mrf.mxu0  ;;  %v1922_v43 = vpop.permute.xlu1 %1921 }
0x190f   :  { %v1924_v44 = vmul.f32 %v2854_v10, %v1922_v43  ;;  %v2413_v61 = vmul.f32 -1.442695, %v1822_v60  ;;  %v964_v40 = vmul.f32 %v3504_v51, %v3388_v18 }
0x1910   :  { %v1819_v52 = vpop.f32.mrf.mxu0 }
0x1911   :  { %1926 = vrot.lane.b32.xlu0 %v1924_v44, %s3073_s29  ;;  %2855 = vpow2.f32 %v2413_v61 }
0x1912   :  { %v2695_v53 = vpop.f32.mrf.mxu0  ;;  %v1935_v50 = vpop.permute.xlu1 %1934 }
0x1915   :  { %1831 = vrot.lane.b32.xlu0 %v1829_v54, %s3073_s29 }
0x191e   :  { %v2856_v58 = vpop.eup %2855 }
0x191f   :  { %v1826_v37 = vadd.f32 1.0, %v2856_v58 }
0x1921   :  { %2857 = vrcp.f32 %v1826_v37 }
0x192e   :  { %v2858_v2 = vpop.eup %2857 }
0x192f   :  { %v1841_v16 = vsub.f32 1.0, %v2858_v2 }
0x1983   :  { %v1927_v62 = vpop.permute.xlu0 %1926 }
0x1984   :  { %v1929_v63 = vadd.f32 %v1927_v62, %v3257_v20 }
0x1986   :  { %2859 = vtanh.f32 %v1929_v63 }
0x1987   :  { %v1832_v7 = vpop.permute.xlu0 %1831 }
0x1988   :  { %v1834_v8 = vmul.f32 %v2858_v2, %v1832_v7 }
0x198a   :  { %1836 = vrot.lane.b32.xlu0 %v1834_v8, %s3073_s29  ;;  %v738_v8 = vmul.f32 %v3448_v45, %v3332_v19  ;;  %v2093_v19 = vld [vmem:[#allocation12] sm:$0xff] }
0x198e   :  { %1865 = vperm.xlu0 %2761, %v2414_v9   ;;  %v1190_v9 = vmul.f32 %v3559_v1, %v3453_v49 }
0x1993   :  { %v2860_v27 = vpop.eup %2859 }
0x1994   :  { %v1937_v12 = vsub.f32 %v2860_v27, %v1935_v50  ;;  %v1628_v27 = vmul.f32 %v3671_v13, %v3576_v15  ;;  %v2096_v50 = vld [vmem:[#allocation12 + $0x18] sm:$0xff] }
0x1995   :  { %2720 = vmatprep.subr.mxu0 %v2096_v50 }
0x1996   :  { %1939 = vrot.lane.b32.xlu1 %v1937_v12, %s3085_s4  ;;  %v2095_v12 = vld [vmem:[#allocation12 + $0x10] sm:$0xff] }
0x199a   :  { %1843 = vrot.lane.b32.xlu1 %v3671_v13, %s3086_s21 }
0x19fc   :  { %v1837_v20 = vpop.permute.xlu0 %1836 }
0x19fd   :  { %v1839_v5 = vadd.f32 %v1837_v20, %v1770_v59  ;;  %v2094_v20 = vld [vmem:[#allocation12 + $0x8] sm:$0xff] }
0x19ff   :  { %2861 = vtanh.f32 %v1839_v5 }
0x1a08   :  { %v1940_v34 = vpop.permute.xlu1 %1939 }
0x1a09   :  { %v1942_v25 = vmul.f32 %v1940_v34, %v1931_v30  ;;  %v3710_v0 = vpop.permute.xlu0 %1865 }
0x1a0b   :  { %v1944_v11 = vrot.slane %v1942_v25, 6 }
0x1a0c   :  { %v2862_v14 = vpop.eup %2861  ;;  %v1844_v42 = vpop.permute.xlu1 %1843 }
0x1a0d   :  { %v1846_v31 = vsub.f32 %v2862_v14, %v1844_v42  ;;  %1945 = vrot.lane.b32.xlu1 %v1944_v11, %s3085_s4 }
0x1a0f   :  { %1848 = vrot.lane.b32.xlu0 %v1846_v31, %s3085_s4 }
0x1a7f   :  { %v1946_v48 = vpop.permute.xlu1 %1945 }
0x1a80   :  { %v1948_v36 = vmul.f32 %v1946_v48, %v3710_v0  ;;  %v2232_v48 = vld [vmem:[#allocation14 + $0x10] sm:$0xff] }
0x1a81   :  { %v1849_v17 = vpop.permute.xlu0 %1848 }
0x1a82   :  { %v1851_v23 = vmul.f32 %v1849_v17, %v1841_v16  ;;  %1950 = vrot.lane.b32.xlu1 %v1948_v36, %s3086_s21  ;;  %v2231_v36 = vld [vmem:[#allocation14 + $0x8] sm:$0xff]  ;;  %v2230_v16 = vld [vmem:[#allocation14] sm:$0xff]  ;;  %v2420_v17 = vld [vmem:[%s3809_s11] ss:$0 sm:$0xff] }
0x1a84   :  { %v1852_v24 = vmul.f32 %v1851_v23, %v3648_v47 }
0x1a86   :  { %v3716_v26 = vadd.f32 %v1852_v24, %v3671_v13 }
0x1a88   :  { %v2001_v46 = vpack.c.bf16 %v3716_v26, %v3716_v26  ;;  %v1854_v43 = vmul.f32 %v3716_v26, %v3648_v47 }
0x1a8a   :  { %2003 = vrot.lane.b32.xlu0 %v2001_v46, %s3085_s4 }
0x1af4   :  { %v1951_v28 = vpop.permute.xlu1 %1950 }
0x1af5   :  { %v1953_v3 = vadd.f32 %v1951_v28, %v3657_v6  ;;  %v511_v6 = vmul.f32 %v3392_v29, %v3295_v41 }
0x1af7   :  { %v1954_v32 = vpack.c.bf16 %v1953_v3, %v1953_v3 }
0x1af9   :  { %1956 = vrot.lane.b32.xlu1 %v1954_v32, %s3085_s4 }
0x1afc   :  { %v2004_v22 = vpop.permute.xlu0 %2003 }
0x1afd   :  { %2717 = vmatmul.mubr.msk.bf16.vlgmr.msra.gmra.mxu1 %vm280_vm3, %v2004_v22 }
0x1b6b   :  { %v1957_v55 = vpop.permute.xlu1 %1956 }
0x1b6c   :  { %2709 = vmatmul.mubr.msk.bf16.vlgmr.msra.gmra.mxu0 %vm280_vm3, %v1957_v55 }
0x1b6d   :  { %2721 = vmatpush3.msra.mxu0 %v2096_v50 }
0x1b6e   :  { %2722 = vmatprep.subr.mxu0 %v2095_v12 }
0x1b6f   :  { %2723 = vmatpush3.msra.mxu0 %v2095_v12 }
0x1b70   :  { %2724 = vmatprep.subr.mxu0 %v2094_v20 }
0x1b71   :  { %2725 = vmatpush3.msra.mxu0 %v2094_v20 }
0x1b72   :  { %2726 = vmatprep.subr.mxu0 %v2093_v19 }
0x1b73   :  { %2727 = vmatpush3.msra.mxu0 %v2093_v19 }
0x1bbd   :  { %v2042_v38 = vpop.f32.mrf.mxu1 }
0x1bbe   :  { %v2055_v39 = vadd.f32 %v2042_v38, %v3368_v56  ;;  %v1402_v56 = vmul.f32 %v3614_v35, %v3518_v33 }
0x1bbf   :  { %v2718_v21 = vpop.f32.mrf.mxu1 }
0x1bc0   :  { %2057 = vrot.lane.b32.xlu0 %v2055_v39, %s3073_s29 }
0x1bc1   :  { %v2045_v4 = vpop.f32.mrf.mxu1 }
0x1bc3   :  { %v2719_v10 = vpop.f32.mrf.mxu1 }
0x1bc4   :  { %2069 = vrot.lane.b32.xlu0 %v3716_v26, %s3086_s21 }
0x1bc8   :  { %513 = vrot.lane.b32.xlu0 %v511_v6, %s3085_s4 }
0x1bcc   :  { %966 = vrot.lane.b32.xlu0 %v964_v40, %s3085_s4 }
0x1bd0   :  { %1404 = vrot.lane.b32.xlu0 %v1402_v56, %s3085_s4 }
0x1bd4   :  { %1856 = vrot.lane.b32.xlu0 %v1854_v43, %s3085_s4 }
0x1c2c   :  { %v1995_v44 = vpop.f32.mrf.mxu0 }
0x1c2d   :  { %v1996_v41 = vadd.f32 %v3698_v57, %v1995_v44 }
0x1c2e   :  { %v2710_v29 = vpop.f32.mrf.mxu0 }
0x1c2f   :  { %v2048_v52 = vadd.f32 %v2042_v38, %v1996_v41 }
0x1c30   :  { %v1998_v53 = vpop.f32.mrf.mxu0 }
0x1c31   :  { %v2419_v54 = vmul.f32 -1.442695, %v2048_v52 }
0x1c32   :  { %v2711_v18 = vpop.f32.mrf.mxu0  ;;  %v2058_v51 = vpop.permute.xlu0 %2057 }
0x1c33   :  { %2863 = vpow2.f32 %v2419_v54 }
0x1c36   :  { %v2070_v59 = vpop.permute.xlu0 %2069 }
0x1c3a   :  { %v514_v33 = vpop.permute.xlu0 %513 }
0x1c3b   :  { %517 = vst.msk [vmem:[#allocation2] sm:$0x3] %vm516_vm11, %v514_v33 }
0x1c3e   :  { %v967_v35 = vpop.permute.xlu0 %966 }
0x1c3f   :  { %969 = vst.msk [vmem:[#allocation2 + $0x4] sm:$0x3] %vm516_vm11, %v967_v35 }
0x1c40   :  { %v2864_v47 = vpop.eup %2863 }
0x1c41   :  { %v2052_v60 = vadd.f32 1.0, %v2864_v47  ;;  %v2213_v47 = vlaneseq }
0x1c42   :  { %v1405_v61 = vpop.permute.xlu0 %1404 }
0x1c43   :  { %2865 = vrcp.f32 %v2052_v60  ;;  %1407 = vst.msk [vmem:[#allocation2 + $0x8] sm:$0x3] %vm516_vm11, %v1405_v61  ;;  %v2214_v60 = vshrl.u32 %v2213_v47, 7  ;;  %v2211_v61 = vld [vmem:[%s3810_s12] sm:$0x1]  ;;  %s2342_s12 = sshll.u32 %s3087_s19, 4  ;;  %s2343_s12 = int_to_ptr.vmem [resolvable:$true] %s2342_s12 }
0x1c44   :  { %s3019_s7 = scalar_lea.vmem %s2343_s12, 32  ;;  %p3024_p8 = scmp.lt.s32.totalorder %s2343_s12, %s2343_s12 }
0x1c45   :  { %p3020_p7 = scmp.ne.s32.totalorder %s2343_s12, %s3019_s7  ;;  %p3025_p9 = scmp.lt.s32.totalorder %s3019_s7, %s3019_s7 }
0x1c46   :  { %v1857_v57 = vpop.permute.xlu0 %1856 }
0x1c47   :  { %1859 = vst.msk [vmem:[#allocation2 + $0xc] sm:$0x3] %vm516_vm11, %v1857_v57  ;;  %v2215_v57 = vsub.s32 0, %v2214_v60  ;;  %p3026_p10 = por %p3025_p9, %p3024_p8 }
0x1c49   :  { %p3027_p11 = pnand %p3026_p10, %p3020_p7 }
0x1c50   :  { %v2866_v58 = vpop.eup %2865 }
0x1c51   :  { %v2060_v37 = vmul.f32 %v2866_v58, %v2058_v51  ;;  %v2067_v45 = vsub.f32 1.0, %v2866_v58 }
0x1c53   :  { %2062 = vrot.lane.b32.xlu1 %v2060_v37, %s3073_s29 }
0x1cc5   :  { %v2063_v62 = vpop.permute.xlu1 %2062 }
0x1cc6   :  { %v2065_v63 = vadd.f32 %v2063_v62, %v1996_v41 }
0x1cc8   :  { %2867 = vtanh.f32 %v2065_v63  ;;  %v2423_v63 = vld [vmem:[%s3811_s13] ss:$0 sm:$0xff] }
0x1cd5   :  { %v2868_v2 = vpop.eup %2867 }
0x1cd6   :  { %v2072_v7 = vsub.f32 %v2868_v2, %v2070_v59 }
0x1cd8   :  { %2074 = vrot.lane.b32.xlu1 %v2072_v7, %s3085_s4 }
0x1cdc   :  { %740 = vrot.lane.b32.xlu1 %v738_v8, %s3085_s4 }
0x1ce0   :  { %1192 = vrot.lane.b32.xlu1 %v1190_v9, %s3085_s4 }
0x1ce4   :  { %1630 = vrot.lane.b32.xlu1 %v1628_v27, %s3085_s4 }
0x1d4a   :  { %v2075_v5 = vpop.permute.xlu1 %2074 }
0x1d4b   :  { %v2077_v49 = vmul.f32 %v2075_v5, %v2067_v45 }
0x1d4d   :  { %v2078_v1 = vmul.f32 %v2077_v49, %v3710_v0 }
0x1d4e   :  { %v741_v15 = vpop.permute.xlu1 %740 }
0x1d4f   :  { %v2079_v13 = vadd.f32 %v2078_v1, %v3716_v26  ;;  %743 = vst.msk [vmem:[#allocation2 + $0x2] sm:$0x3] %vm516_vm11, %v741_v15 }
0x1d51   :  { %v2080_v30 = vmul.f32 %v2079_v13, %v3710_v0  ;;  %2087 = vrot.lane.b32.xlu0 %v2079_v13, %s3085_s4  ;;  %v2233_v0 = vld [vmem:[#allocation14 + $0x18] sm:$0xff] }
0x1d52   :  { %v1193_v34 = vpop.permute.xlu1 %1192  ;;  %2731 = vmatprep.subr.mxu1 %v2233_v0 }
0x1d53   :  { %1195 = vst.msk [vmem:[#allocation2 + $0x6] sm:$0x3] %vm516_vm11, %v1193_v34  ;;  %2082 = vrot.lane.b32.xlu1 %v2080_v30, %s3085_s4  ;;  %2732 = vmatpush3.msra.mxu1 %v2233_v0 }
0x1d54   :  { %2733 = vmatprep.subr.mxu1 %v2232_v48 }
0x1d55   :  { %2734 = vmatpush3.msra.mxu1 %v2232_v48 }
0x1d56   :  { %v1631_v25 = vpop.permute.xlu1 %1630  ;;  %2735 = vmatprep.subr.mxu1 %v2231_v36 }
0x1d57   :  { %1633 = vst.msk [vmem:[#allocation2 + $0xa] sm:$0x3] %vm516_vm11, %v1631_v25  ;;  %2736 = vmatpush3.msra.mxu1 %v2231_v36 }
0x1d58   :  { %2737 = vmatprep.subr.mxu1 %v2230_v16 }
0x1d59   :  { %2738 = vmatpush3.msra.mxu1 %v2230_v16 }
0x1d5a   :  { %v2091_v11 = vld [vmem:[#allocation2] sm:$0xff] }
0x1d5b   :  { %2728 = vmatprep.mubr.msk.f32.mxu0 %vm280_vm3, %v2091_v11 }
0x1dc3   :  { %v2088_v14 = vpop.permute.xlu0 %2087 }
0x1dc4   :  { %2090 = vst.msk [vmem:[#allocation16] sm:$0x3] %vm516_vm11, %v2088_v14 }
0x1dc5   :  { %v2083_v42 = vpop.permute.xlu1 %2082 }
0x1dc6   :  { %2085 = vst.msk [vmem:[#allocation2 + $0xe] sm:$0x3] %vm516_vm11, %v2083_v42 }
0x1dcd   :  { %v2092_v31 = vld [vmem:[#allocation2 + $0x8] sm:$0xff] }
0x1dce   :  { %2729 = vmatmul.mubr.msk.f32.vlgmr.msra.gmra.mxu0 %vm280_vm3, %v2092_v31 }
0x1e8e   :  { %v2730_v23 = vpop.f32.mrf.mxu0 }
0x1e8f   :  { %v2182_v24 = vadd.f32 %v2730_v23, %v2420_v17 }
0x1e90   :  { %v2176_v26 = vpop.f32.mrf.mxu0 }
0x1e91   :  { %v2177_v46 = vadd.f32 %v2420_v17, %v2176_v26  ;;  %v2186_v28 = vsel %vm280_vm3, %v2182_v24, 0.0 }
0x1e93   :  { %v2185_v3 = vsel %vm280_vm3, %v2177_v46, 0.0 }
0x1e94   :  { %v2187_v32 = vadd.f32 %v2186_v28, %v2185_v3 }
0x1e96   :  { %v2188_v22 = vrot.slane %v2187_v32, 4 }
0x1e98   :  { %v2189_v55 = vadd.f32 %v2188_v22, %v2187_v32 }
0x1e9a   :  { %v2190_v38 = vrot.slane %v2189_v55, 2 }
0x1e9c   :  { %v2191_v39 = vadd.f32 %v2190_v38, %v2189_v55 }
0x1e9e   :  { %v2192_v21 = vrot.slane %v2191_v39, 1 }
0x1ea0   :  { %v2193_v4 = vadd.f32 %v2192_v21, %v2191_v39 }
0x1ea2   :  { %v2194_v10 = vmul.f32 0.0625, %v2193_v4 }
0x1ea4   :  { %v2195_v6 = vsub.f32 %v2177_v46, %v2194_v10  ;;  %v2196_v40 = vsub.f32 %v2182_v24, %v2194_v10 }
0x1ea6   :  { %v2197_v56 = vmul.f32 %v2195_v6, %v2195_v6  ;;  %v2198_v43 = vmul.f32 %v2196_v40, %v2196_v40 }
0x1ea8   :  { %v2199_v44 = vsel %vm280_vm3, %v2197_v56, 0.0  ;;  %v2200_v41 = vsel %vm280_vm3, %v2198_v43, 0.0 }
0x1ea9   :  { %v2201_v29 = vadd.f32 %v2200_v41, %v2199_v44 }
0x1eab   :  { %v2202_v52 = vrot.slane %v2201_v29, 4 }
0x1ead   :  { %v2203_v53 = vadd.f32 %v2202_v52, %v2201_v29 }
0x1eaf   :  { %v2204_v54 = vrot.slane %v2203_v53, 2 }
0x1eb1   :  { %v2205_v18 = vadd.f32 %v2204_v54, %v2203_v53 }
0x1eb3   :  { %v2206_v51 = vrot.slane %v2205_v18, 1 }
0x1eb5   :  { %v2207_v59 = vadd.f32 %v2206_v51, %v2205_v18 }
0x1eb7   :  { %v2208_v33 = vmul.f32 0.0625, %v2207_v59 }
0x1eb9   :  { %v2209_v35 = vadd.f32 1e-05, %v2208_v33 }
0x1ebb   :  { %2869 = vrsqrt.f32 %v2209_v35 }
0x1ec8   :  { %v2870_v58 = vpop.eup %2869 }
0x1ec9   :  { %v2212_v37 = vmul.f32 %v2870_v58, %v2211_v61 }
0x1ecb   :  { %v2216_v62 = vrot.slane %v2212_v37, %v2215_v57 }
0x1ecd   :  { %v2217_v2 = vmul.f32 %v2216_v62, %v2195_v6  ;;  %v2218_v7 = vmul.f32 %v2216_v62, %v2196_v40 }
0x1ecf   :  { %v2226_v8 = vadd.f32 %v2423_v63, %v2217_v2  ;;  %v2227_v9 = vadd.f32 %v2423_v63, %v2218_v7 }
0x1ed1   :  { %v2228_v27 = vmax.f32 %v2226_v8, 0.0  ;;  %v2229_v50 = vmax.f32 %v2227_v9, 0.0 }
0x1ed3   :  { %2739 = vmatprep.mubr.msk.f32.mxu1 %vm280_vm3, %v2228_v27 }
0x1ed4   :  { %2740 = vmatmul.mubr.msk.f32.vlgmr.msra.gmra.mxu1 %vm280_vm3, %v2229_v50 }
0x1ed5   :  { %3030 = shalt.err (!%p3027_p11)
}
0x1ed6   :  { %2345 = dma.vmem_to_hbm [thread:$0]  %s2343_s12, 32, %s3815_s17, [#allocation17]   ;;  %v2424_v12 = vld [vmem:[%s3813_s15] ss:$0 sm:$0xff] }
0x1ed7   :  { %s3088_s1 = smov [#allocation15]  }
0x1ed8   :  { %s2329_s20 = sshll.u32 %s3088_s1, 4  ;;  %s2330_s20 = int_to_ptr.vmem [resolvable:$true] %s2329_s20 }
0x1ed9   :  { %s3039_s10 = scalar_lea.vmem %s2330_s20, 256  ;;  %p3044_p13 = scmp.lt.s32.totalorder %s2330_s20, %s2330_s20 }
0x1eda   :  { %p3040_p12 = scmp.ne.s32.totalorder %s2330_s20, %s3039_s10  ;;  %p3045_p0 = scmp.lt.s32.totalorder %s3039_s10, %s3039_s10 }
0x1edc   :  { %p3046_p1 = por %p3045_p0, %p3044_p13 }
0x1ede   :  { %p3047_p2 = pnand %p3046_p1, %p3040_p12 }
0x1f94   :  { %v2741_v20 = vpop.f32.mrf.mxu1 }
0x1f95   :  { %v2319_v19 = vadd.f32 %v2741_v20, %v2424_v12 }
0x1f96   :  { %v2313_v45 = vpop.f32.mrf.mxu1 }
0x1f97   :  { %2323 = vst.msk [vmem:[#allocation15 + $0x8] sm:$0xff] %vm280_vm3, %v2319_v19  ;;  %v2314_v5 = vadd.f32 %v2424_v12, %v2313_v45 }
0x1f99   :  { %2322 = vst.msk [vmem:[#allocation15] sm:$0xff] %vm280_vm3, %v2314_v5 }
0x1f9a   :  { %3050 = shalt.err (!%p3047_p2)
}
0x1f9b   :  { %2335 = dma.vmem_to_hbm [thread:$0]  %s2330_s20, 256, %s3814_s16, [#allocation5], %s3076_s2, %s3076_s2, %s3077_s24  }
0x1f9c   :  { %3067 = dma.done.wait [#allocation5], 256  }
0x1f9d   :  { %3068 = vsyncadd [#allocation5], 4294967040 }
0x1f9e   :  { %3069 = dma.done.wait [#allocation17], 32  }
0x1f9f   :  { %3070 = vsyncadd [#allocation17], 4294967264 }
0x1fa0   :  { %2352 = vsyncpa [#allocation4], 1 }
0x1fa1   :  { %2353 = vsyncpa [#allocation7], 1 }
0x1fa2   :  { %2354 = vsyncpa [#allocation10], 1 }
0x1fa3   :  { %2355 = vsyncpa [#allocation13], 1 }
0x1fa4   :  { %2356 = vsyncpa [#allocation5], 1 }
0x1fa5   :  { %2357 = vsyncpa [#allocation17], 1 }

</bundles_post_ra>
